<compile_context>
chip_gen: v6e
topology: v6e:2x2x1
jax: 0.10.0
libtpu: 0.0.40
codegen_flags: <defaults>
</compile_context>

<pallas_src>
import jax
import jax.numpy as jnp
from jax.experimental import pallas as pl
from jax.experimental.pallas import tpu as pltpu

LN_EPS = 1e-5
LEAKY_SLOPE = 0.01


def _round_up(x, m):
    return ((x + m - 1) // m) * m


def _layernorm(x, gamma, beta):
    mu = jnp.mean(x, axis=-1, keepdims=True)
    var = jnp.mean(jnp.square(x - mu), axis=-1, keepdims=True)
    return (x - mu) * jax.lax.rsqrt(var + LN_EPS) * gamma + beta


# --------------------------------------------------------------------------
# Kernel 1: sequential GRU recurrence over time (input projection already done)
# --------------------------------------------------------------------------
def gru_recurrence_kernel(
    xp_ref,      # [B, T_BLK, 3H]  pre-projected inputs: x@W_i + b_i  (f32)
    w_h_ref,     # [H, 3H]         fused hidden weights (r|z|n)
    b_h_ref,     # [1, 3H]         fused hidden biases  (0|0|b_hn)
    h_out_ref,   # [B, T_BLK, H]   hidden states, written batch-major
    h_carry,     # VMEM scratch [B, H] f32, carried across grid steps
):
    t_blk = xp_ref.shape[1]
    H = h_carry.shape[-1]

    @pl.when(pl.program_id(0) == 0)
    def _():
        h_carry[...] = jnp.zeros_like(h_carry)

    w_h = w_h_ref[...]
    b_h = b_h_ref[...]

    h = h_carry[...]  # [B, H] f32
    # Fully unrolled time loop (T_BLK is a compile-time constant): equivalent
    # to lax.fori_loop(..., unroll=True) but with all-static ref indices.
    for i in range(t_blk):
        xp = xp_ref[:, i, :]                                        # [B, 3H]
        hp = jnp.dot(h.astype(w_h.dtype), w_h,
                     preferred_element_type=jnp.float32) + b_h      # [B, 3H]
        r = jax.nn.sigmoid(xp[:, 0 * H:1 * H] + hp[:, 0 * H:1 * H])
        z = jax.nn.sigmoid(xp[:, 1 * H:2 * H] + hp[:, 1 * H:2 * H])
        n = jnp.tanh(xp[:, 2 * H:3 * H] + r * hp[:, 2 * H:3 * H])
        h = (1.0 - z) * n + z * h
        h_out_ref[:, i, :] = h
    h_carry[...] = h


# --------------------------------------------------------------------------
# Kernel 2: batched, timestep-independent head over rows of [N, H]
#   LN -> Linear -> LeakyReLU -> LN -> Linear
# --------------------------------------------------------------------------
def head_kernel(
    h_ref,       # [R_BLK, H] f32
    vecs_ref,    # [5, H]  rows: g1, be1, bv1, g2, be2   (f32)
    w1_ref,      # [H, H]
    w2_ref,      # [H, O]
    bv2_ref,     # [1, O]  (f32)
    out_ref,     # [R_BLK, O]
):
    g1 = vecs_ref[0:1]
    be1 = vecs_ref[1:2]
    bv1 = vecs_ref[2:3]
    g2 = vecs_ref[3:4]
    be2 = vecs_ref[4:5]

    w1 = w1_ref[...]
    w2 = w2_ref[...]

    y = _layernorm(h_ref[...], g1, be1)
    y = jnp.dot(y.astype(w1.dtype), w1, preferred_element_type=jnp.float32) + bv1
    y = jnp.where(y >= 0.0, y, LEAKY_SLOPE * y)
    y = _layernorm(y, g2, be2)
    y = jnp.dot(y.astype(w2.dtype), w2, preferred_element_type=jnp.float32) + bv2_ref[...]
    out_ref[...] = y.astype(out_ref.dtype)


# --------------------------------------------------------------------------
# Wrapper
# --------------------------------------------------------------------------
def encoder_forward(X_btd, params, *, t_blk=16, row_blk=None,
                    compute_dtype=jnp.float32):
    """X_btd: [B, T, input_size] (PyTorch layout). Returns [B, T, output_size]."""
    f32 = jnp.float32
    B, T, D = X_btd.shape
    H = params["w_hr"].shape[0]
    O = params["w2"].shape[1]

    # ---- fuse parameters (one-time; pre-fuse in production) -------------
    w_i = jnp.concatenate([params["w_ir"], params["w_iz"], params["w_in"]],
                          axis=1).astype(compute_dtype)              # [D, 3H]
    b_i = jnp.concatenate([params["b_r"], params["b_z"], params["b_in"]],
                          axis=1).astype(f32)                        # [1, 3H]
    w_h = jnp.concatenate([params["w_hr"], params["w_hz"], params["w_hn"]],
                          axis=1).astype(compute_dtype)              # [H, 3H]
    zeros_h = jnp.zeros((1, H), f32)
    b_h = jnp.concatenate([zeros_h, zeros_h, params["b_hn"].astype(f32)],
                          axis=1)                                    # [1, 3H]
    head_vecs = jnp.concatenate(
        [params["g1"], params["be1"], params["bv1"], params["g2"], params["be2"]],
        axis=0).astype(f32)                                          # [5, H]
    w1 = params["w1"].astype(compute_dtype)                          # [H, H]
    w2 = params["w2"].astype(compute_dtype)                          # [H, O]
    bv2 = params["bv2"].astype(f32)                                  # [1, O]

    # ---- stage 0: input projection hoisted out of the recurrence --------
    # One batched [B*T, D] @ [D, 3H] matmul; the PyTorch time-major permute is
    # folded into the contraction (no transpose pass over X).
    xp = jnp.einsum("btd,dg->btg", X_btd.astype(compute_dtype), w_i,
                    preferred_element_type=f32) + b_i                # [B, T, 3H] f32

    # pad T to a multiple of the per-grid-step time block
    if T <= t_blk:
        t_blk_eff = T
    else:
        t_blk_eff = max(8, (t_blk // 8) * 8)
    T_pad = _round_up(T, t_blk_eff)
    if T_pad != T:
        xp = jnp.pad(xp, ((0, 0), (0, T_pad - T), (0, 0)))

    # ---- stage 1: sequential GRU recurrence ------------------------------
    h_all = pl.pallas_call(
        gru_recurrence_kernel,
        out_shape=jax.ShapeDtypeStruct((B, T_pad, H), f32),
        grid_spec=pltpu.PrefetchScalarGridSpec(
            num_scalar_prefetch=0,
            grid=(T_pad // t_blk_eff,),
            in_specs=[
                pl.BlockSpec((B, t_blk_eff, 3 * H), lambda t: (0, t, 0)),
                pl.BlockSpec((H, 3 * H), lambda t: (0, 0)),
                pl.BlockSpec((1, 3 * H), lambda t: (0, 0)),
            ],
            out_specs=pl.BlockSpec((B, t_blk_eff, H), lambda t: (0, t, 0)),
            scratch_shapes=[pltpu.VMEM((B, H), f32)],
        ),
        compiler_params=pltpu.CompilerParams(
            dimension_semantics=("arbitrary",),   # sequential recurrence over time
        ),
    )(xp, w_h, b_h)

    # ---- stage 2: batched head over all (batch, time) rows ---------------
    N = B * T_pad
    h_flat = h_all.reshape(N, H)              # contiguous; no data movement

    if row_blk is None:
        row_blk = min(512, _round_up(N, 8))
    row_blk = max(8, (row_blk // 8) * 8)
    N_pad = _round_up(N, row_blk)
    if N_pad != N:
        h_flat = jnp.pad(h_flat, ((0, N_pad - N), (0, 0)))

    out_flat = pl.pallas_call(
        head_kernel,
        out_shape=jax.ShapeDtypeStruct((N_pad, O), f32),
        grid_spec=pltpu.PrefetchScalarGridSpec(
            num_scalar_prefetch=0,
            grid=(N_pad // row_blk,),
            in_specs=[
                pl.BlockSpec((row_blk, H), lambda i: (i, 0)),
                pl.BlockSpec((5, H), lambda i: (0, 0)),
                pl.BlockSpec((H, H), lambda i: (0, 0)),
                pl.BlockSpec((H, O), lambda i: (0, 0)),
                pl.BlockSpec((1, O), lambda i: (0, 0)),
            ],
            out_specs=pl.BlockSpec((row_blk, O), lambda i: (i, 0)),
        ),
        compiler_params=pltpu.CompilerParams(
            dimension_semantics=("parallel",),    # megacore-shardable on v7x
        ),
    )(h_flat, head_vecs, w1, w2, bv2)

    return out_flat[:N].reshape(B, T_pad, O)[:, :T, :]


# --------------------------------------------------------------------------
# Parameters + pure-JAX reference
# --------------------------------------------------------------------------
def make_params(key, input_size, hidden_size, output_size):
    ks = jax.random.split(key, 18)
    scale = 0.2

    def w(k, shape):
        return scale * jax.random.normal(k, shape, dtype=jnp.float32)

    H, D, O = hidden_size, input_size, output_size
    return {
        "w_ir": w(ks[0], (D, H)), "w_iz": w(ks[1], (D, H)), "w_in": w(ks[2], (D, H)),
        "w_hr": w(ks[3], (H, H)), "w_hz": w(ks[4], (H, H)), "w_hn": w(ks[5], (H, H)),
        "b_r": w(ks[6], (1, H)), "b_z": w(ks[7], (1, H)),
        "b_in": w(ks[8], (1, H)), "b_hn": w(ks[9], (1, H)),
        "g1": jnp.ones((1, H), jnp.float32), "be1": jnp.zeros((1, H), jnp.float32),
        "w1": w(ks[10], (H, H)), "bv1": w(ks[11], (1, H)),
        "g2": jnp.ones((1, H), jnp.float32), "be2": jnp.zeros((1, H), jnp.float32),
        "w2": w(ks[12], (H, O)), "bv2": w(ks[13], (1, O)),
    }


def encoder_reference(X_btd, params):
    """Pure-JAX reference (PyTorch-style math) for correctness checking."""
    X_tbd = jnp.transpose(X_btd, (1, 0, 2)).astype(jnp.float32)
    B = X_tbd.shape[1]
    H = params["w_hr"].shape[0]

    def step(h, x):
        r = jax.nn.sigmoid(x @ params["w_ir"] + h @ params["w_hr"] + params["b_r"])
        z = jax.nn.sigmoid(x @ params["w_iz"] + h @ params["w_hz"] + params["b_z"])
        n = jnp.tanh(x @ params["w_in"] + params["b_in"]
                     + r * (h @ params["w_hn"] + params["b_hn"]))
        h_new = (1.0 - z) * n + z * h
        y = _layernorm(h_new, params["g1"], params["be1"])
        y = y @ params["w1"] + params["bv1"]
        y = jnp.where(y >= 0.0, y, LEAKY_SLOPE * y)
        y = _layernorm(y, params["g2"], params["be2"])
        y = y @ params["w2"] + params["bv2"]
        return h_new, y

    _, out_tbo = jax.lax.scan(step, jnp.zeros((B, H), jnp.float32), X_tbd)
    return jnp.transpose(out_tbo, (1, 0, 2))


if __name__ == "__main__":
    B, T = 2, 8
    input_size, hidden_size, output_size = 4, 32, 16

    key = jax.random.PRNGKey(0)
    kx, kp = jax.random.split(key)
    X = jax.random.normal(kx, (B, T, input_size), dtype=jnp.float32)
    params = make_params(kp, input_size, hidden_size, output_size)

    ref = jax.block_until_ready(encoder_reference(X, params))

    # f32 path (reference-accurate)
    out = jax.block_until_ready(encoder_forward(X, params))
    assert out.shape == (B, T, output_size)
    assert jnp.allclose(out, ref, atol=1e-4, rtol=1e-4), "f32 mismatch vs JAX reference"

    # bf16 MXU-operand path (v6e/v7x-oriented); accumulation / gates / LN stay f32
    out_bf16 = jax.block_until_ready(
        encoder_forward(X, params, compute_dtype=jnp.bfloat16))
    assert out_bf16.shape == (B, T, output_size)
    assert jnp.all(jnp.isfinite(out_bf16))
    assert jnp.allclose(out_bf16, ref, atol=1e-1, rtol=1e-1), "bf16 mismatch vs JAX reference"

    print("KERNEL_OK")
</pallas_src>

<mosaic_0001>
module attributes {stable_mosaic.version = 11 : i64} {
  func.func @gru_recurrence_kernel(%arg0: i32, %arg1: memref<2x8x96xf32, #tpu.memory_space<vmem>>, %arg2: memref<32x96xf32, #tpu.memory_space<vmem>>, %arg3: memref<1x96xf32, #tpu.memory_space<vmem>>, %arg4: memref<2x8x32xf32, #tpu.memory_space<vmem>>, %arg5: memref<2x32xf32, #tpu.memory_space<vmem>>) attributes {dimension_semantics = [#tpu.dimension_semantics<arbitrary>], iteration_bounds = array<i64: 1>, scalar_prefetch = 0 : i64, scratch_operands = 1 : i64, tpu.core_type = #tpu.core_type<tc>, window_params = [{transform_indices = @transform_0, window_bounds = array<i64: 2, 8, 96>}, {pipeline_mode = #tpu.pipeline_mode<synchronous>, transform_indices = @transform_1, window_bounds = array<i64: 32, 96>}, {pipeline_mode = #tpu.pipeline_mode<synchronous>, transform_indices = @transform_2, window_bounds = array<i64: 1, 96>}, {transform_indices = @transform_3, window_bounds = array<i64: 2, 8, 32>}]} {
    %c0_i32 = arith.constant 0 : i32
    %0 = arith.cmpi eq, %arg0, %c0_i32 : i32
    %1 = arith.extui %0 : i1 to i32
    %c0_i32_0 = arith.constant 0 : i32
    %2 = arith.cmpi ne, %1, %c0_i32_0 : i32
    scf.if %2 {
      %cst_80 = arith.constant 0.000000e+00 : f32
      %279 = vector.broadcast %cst_80 : f32 to vector<2x32xf32>
      %c0_81 = arith.constant 0 : index
      %c0_82 = arith.constant 0 : index
      %280 = vector.load %arg5[%c0_81, %c0_82] : memref<2x32xf32, #tpu.memory_space<vmem>>, vector<2x32xf32>
      tpu.vector_store %arg5[%c0_81, %c0_82], %279 {strides = array<i32>} : memref<2x32xf32, #tpu.memory_space<vmem>>, vector<2x32xf32>,
    } else {
    }
    %c0 = arith.constant 0 : index
    %c0_1 = arith.constant 0 : index
    %3 = vector.load %arg2[%c0, %c0_1] : memref<32x96xf32, #tpu.memory_space<vmem>>, vector<32x96xf32>
    %c0_2 = arith.constant 0 : index
    %c0_3 = arith.constant 0 : index
    %4 = vector.load %arg3[%c0_2, %c0_3] : memref<1x96xf32, #tpu.memory_space<vmem>>, vector<1x96xf32>
    %c0_4 = arith.constant 0 : index
    %c0_5 = arith.constant 0 : index
    %5 = vector.load %arg5[%c0_4, %c0_5] : memref<2x32xf32, #tpu.memory_space<vmem>>, vector<2x32xf32>
    %c0_6 = arith.constant 0 : index
    %c0_7 = arith.constant 0 : index
    %c0_8 = arith.constant 0 : index
    %6 = vector.load %arg1[%c0_6, %c0_7, %c0_8] : memref<2x8x96xf32, #tpu.memory_space<vmem>>, vector<2x1x96xf32>
    %7 = vector.shape_cast %6 : vector<2x1x96xf32> to vector<2x96xf32>
    %cst = arith.constant dense<0.000000e+00> : vector<2x96xf32>
    %8 = tpu.matmul %5, %3, %cst {dimension_numbers = #tpu.dot_dimension_numbers<[1], [0], [0], [1], [0, 0, 1, 1], [], []>} : vector<2x32xf32>, vector<32x96xf32>, vector<2x96xf32> -> vector<2x96xf32>
    %9 = vector.broadcast %4 : vector<1x96xf32> to vector<2x96xf32>
    %10 = arith.addf %8, %9 : vector<2x96xf32>
    %11 = vector.extract_strided_slice %7 {offsets = [0, 0], sizes = [2, 32], strides = [1, 1]} : vector<2x96xf32> to vector<2x32xf32>
    %12 = vector.extract_strided_slice %10 {offsets = [0, 0], sizes = [2, 32], strides = [1, 1]} : vector<2x96xf32> to vector<2x32xf32>
    %13 = arith.addf %11, %12 : vector<2x32xf32>
    %14 = arith.negf %13 : vector<2x32xf32>
    %15 = math.exp %14 : vector<2x32xf32>
    %cst_9 = arith.constant 1.000000e+00 : f32
    %16 = vector.broadcast %cst_9 : f32 to vector<2x32xf32>
    %17 = arith.addf %16, %15 : vector<2x32xf32>
    %18 = arith.divf %16, %17 : vector<2x32xf32>
    %19 = vector.extract_strided_slice %7 {offsets = [0, 32], sizes = [2, 32], strides = [1, 1]} : vector<2x96xf32> to vector<2x32xf32>
    %20 = vector.extract_strided_slice %10 {offsets = [0, 32], sizes = [2, 32], strides = [1, 1]} : vector<2x96xf32> to vector<2x32xf32>
    %21 = arith.addf %19, %20 : vector<2x32xf32>
    %22 = arith.negf %21 : vector<2x32xf32>
    %23 = math.exp %22 : vector<2x32xf32>
    %cst_10 = arith.constant 1.000000e+00 : f32
    %24 = vector.broadcast %cst_10 : f32 to vector<2x32xf32>
    %25 = arith.addf %24, %23 : vector<2x32xf32>
    %26 = arith.divf %24, %25 : vector<2x32xf32>
    %27 = vector.extract_strided_slice %7 {offsets = [0, 64], sizes = [2, 32], strides = [1, 1]} : vector<2x96xf32> to vector<2x32xf32>
    %28 = vector.extract_strided_slice %10 {offsets = [0, 64], sizes = [2, 32], strides = [1, 1]} : vector<2x96xf32> to vector<2x32xf32>
    %29 = arith.mulf %18, %28 : vector<2x32xf32>
    %30 = arith.addf %27, %29 : vector<2x32xf32>
    %31 = math.tanh %30 : vector<2x32xf32>
    %cst_11 = arith.constant 1.000000e+00 : f32
    %32 = vector.broadcast %cst_11 : f32 to vector<2x32xf32>
    %33 = arith.subf %32, %26 : vector<2x32xf32>
    %34 = arith.mulf %33, %31 : vector<2x32xf32>
    %35 = arith.mulf %26, %5 : vector<2x32xf32>
    %36 = arith.addf %34, %35 : vector<2x32xf32>
    %c0_12 = arith.constant 0 : index
    %c0_13 = arith.constant 0 : index
    %c0_14 = arith.constant 0 : index
    %37 = vector.load %arg4[%c0_12, %c0_13, %c0_14] : memref<2x8x32xf32, #tpu.memory_space<vmem>>, vector<2x1x32xf32>
    %38 = vector.shape_cast %37 : vector<2x1x32xf32> to vector<2x32xf32>
    %39 = vector.shape_cast %36 : vector<2x32xf32> to vector<2x1x32xf32>
    tpu.vector_store %arg4[%c0_12, %c0_13, %c0_14], %39 {strides = array<i32>} : memref<2x8x32xf32, #tpu.memory_space<vmem>>, vector<2x1x32xf32>,
    %c0_15 = arith.constant 0 : index
    %c1 = arith.constant 1 : index
    %c0_16 = arith.constant 0 : index
    %40 = vector.load %arg1[%c0_15, %c1, %c0_16] : memref<2x8x96xf32, #tpu.memory_space<vmem>>, vector<2x1x96xf32>
    %41 = vector.shape_cast %40 : vector<2x1x96xf32> to vector<2x96xf32>
    %cst_17 = arith.constant dense<0.000000e+00> : vector<2x96xf32>
    %42 = tpu.matmul %36, %3, %cst_17 {dimension_numbers = #tpu.dot_dimension_numbers<[1], [0], [0], [1], [0, 0, 1, 1], [], []>} : vector<2x32xf32>, vector<32x96xf32>, vector<2x96xf32> -> vector<2x96xf32>
    %43 = vector.broadcast %4 : vector<1x96xf32> to vector<2x96xf32>
    %44 = arith.addf %42, %43 : vector<2x96xf32>
    %45 = vector.extract_strided_slice %41 {offsets = [0, 0], sizes = [2, 32], strides = [1, 1]} : vector<2x96xf32> to vector<2x32xf32>
    %46 = vector.extract_strided_slice %44 {offsets = [0, 0], sizes = [2, 32], strides = [1, 1]} : vector<2x96xf32> to vector<2x32xf32>
    %47 = arith.addf %45, %46 : vector<2x32xf32>
    %48 = arith.negf %47 : vector<2x32xf32>
    %49 = math.exp %48 : vector<2x32xf32>
    %cst_18 = arith.constant 1.000000e+00 : f32
    %50 = vector.broadcast %cst_18 : f32 to vector<2x32xf32>
    %51 = arith.addf %50, %49 : vector<2x32xf32>
    %52 = arith.divf %50, %51 : vector<2x32xf32>
    %53 = vector.extract_strided_slice %41 {offsets = [0, 32], sizes = [2, 32], strides = [1, 1]} : vector<2x96xf32> to vector<2x32xf32>
    %54 = vector.extract_strided_slice %44 {offsets = [0, 32], sizes = [2, 32], strides = [1, 1]} : vector<2x96xf32> to vector<2x32xf32>
    %55 = arith.addf %53, %54 : vector<2x32xf32>
    %56 = arith.negf %55 : vector<2x32xf32>
    %57 = math.exp %56 : vector<2x32xf32>
    %cst_19 = arith.constant 1.000000e+00 : f32
    %58 = vector.broadcast %cst_19 : f32 to vector<2x32xf32>
    %59 = arith.addf %58, %57 : vector<2x32xf32>
    %60 = arith.divf %58, %59 : vector<2x32xf32>
    %61 = vector.extract_strided_slice %41 {offsets = [0, 64], sizes = [2, 32], strides = [1, 1]} : vector<2x96xf32> to vector<2x32xf32>
    %62 = vector.extract_strided_slice %44 {offsets = [0, 64], sizes = [2, 32], strides = [1, 1]} : vector<2x96xf32> to vector<2x32xf32>
    %63 = arith.mulf %52, %62 : vector<2x32xf32>
    %64 = arith.addf %61, %63 : vector<2x32xf32>
    %65 = math.tanh %64 : vector<2x32xf32>
    %cst_20 = arith.constant 1.000000e+00 : f32
    %66 = vector.broadcast %cst_20 : f32 to vector<2x32xf32>
    %67 = arith.subf %66, %60 : vector<2x32xf32>
    %68 = arith.mulf %67, %65 : vector<2x32xf32>
    %69 = arith.mulf %60, %36 : vector<2x32xf32>
    %70 = arith.addf %68, %69 : vector<2x32xf32>
    %c0_21 = arith.constant 0 : index
    %c1_22 = arith.constant 1 : index
    %c0_23 = arith.constant 0 : index
    %71 = vector.load %arg4[%c0_21, %c1_22, %c0_23] : memref<2x8x32xf32, #tpu.memory_space<vmem>>, vector<2x1x32xf32>
    %72 = vector.shape_cast %71 : vector<2x1x32xf32> to vector<2x32xf32>
    %73 = vector.shape_cast %70 : vector<2x32xf32> to vector<2x1x32xf32>
    tpu.vector_store %arg4[%c0_21, %c1_22, %c0_23], %73 {strides = array<i32>} : memref<2x8x32xf32, #tpu.memory_space<vmem>>, vector<2x1x32xf32>,
    %c0_24 = arith.constant 0 : index
    %c2 = arith.constant 2 : index
    %c0_25 = arith.constant 0 : index
    %74 = vector.load %arg1[%c0_24, %c2, %c0_25] : memref<2x8x96xf32, #tpu.memory_space<vmem>>, vector<2x1x96xf32>
    %75 = vector.shape_cast %74 : vector<2x1x96xf32> to vector<2x96xf32>
    %cst_26 = arith.constant dense<0.000000e+00> : vector<2x96xf32>
    %76 = tpu.matmul %70, %3, %cst_26 {dimension_numbers = #tpu.dot_dimension_numbers<[1], [0], [0], [1], [0, 0, 1, 1], [], []>} : vector<2x32xf32>, vector<32x96xf32>, vector<2x96xf32> -> vector<2x96xf32>
    %77 = vector.broadcast %4 : vector<1x96xf32> to vector<2x96xf32>
    %78 = arith.addf %76, %77 : vector<2x96xf32>
    %79 = vector.extract_strided_slice %75 {offsets = [0, 0], sizes = [2, 32], strides = [1, 1]} : vector<2x96xf32> to vector<2x32xf32>
    %80 = vector.extract_strided_slice %78 {offsets = [0, 0], sizes = [2, 32], strides = [1, 1]} : vector<2x96xf32> to vector<2x32xf32>
    %81 = arith.addf %79, %80 : vector<2x32xf32>
    %82 = arith.negf %81 : vector<2x32xf32>
    %83 = math.exp %82 : vector<2x32xf32>
    %cst_27 = arith.constant 1.000000e+00 : f32
    %84 = vector.broadcast %cst_27 : f32 to vector<2x32xf32>
    %85 = arith.addf %84, %83 : vector<2x32xf32>
    %86 = arith.divf %84, %85 : vector<2x32xf32>
    %87 = vector.extract_strided_slice %75 {offsets = [0, 32], sizes = [2, 32], strides = [1, 1]} : vector<2x96xf32> to vector<2x32xf32>
    %88 = vector.extract_strided_slice %78 {offsets = [0, 32], sizes = [2, 32], strides = [1, 1]} : vector<2x96xf32> to vector<2x32xf32>
    %89 = arith.addf %87, %88 : vector<2x32xf32>
    %90 = arith.negf %89 : vector<2x32xf32>
    %91 = math.exp %90 : vector<2x32xf32>
    %cst_28 = arith.constant 1.000000e+00 : f32
    %92 = vector.broadcast %cst_28 : f32 to vector<2x32xf32>
    %93 = arith.addf %92, %91 : vector<2x32xf32>
    %94 = arith.divf %92, %93 : vector<2x32xf32>
    %95 = vector.extract_strided_slice %75 {offsets = [0, 64], sizes = [2, 32], strides = [1, 1]} : vector<2x96xf32> to vector<2x32xf32>
    %96 = vector.extract_strided_slice %78 {offsets = [0, 64], sizes = [2, 32], strides = [1, 1]} : vector<2x96xf32> to vector<2x32xf32>
    %97 = arith.mulf %86, %96 : vector<2x32xf32>
    %98 = arith.addf %95, %97 : vector<2x32xf32>
    %99 = math.tanh %98 : vector<2x32xf32>
    %cst_29 = arith.constant 1.000000e+00 : f32
    %100 = vector.broadcast %cst_29 : f32 to vector<2x32xf32>
    %101 = arith.subf %100, %94 : vector<2x32xf32>
    %102 = arith.mulf %101, %99 : vector<2x32xf32>
    %103 = arith.mulf %94, %70 : vector<2x32xf32>
    %104 = arith.addf %102, %103 : vector<2x32xf32>
    %c0_30 = arith.constant 0 : index
    %c2_31 = arith.constant 2 : index
    %c0_32 = arith.constant 0 : index
    %105 = vector.load %arg4[%c0_30, %c2_31, %c0_32] : memref<2x8x32xf32, #tpu.memory_space<vmem>>, vector<2x1x32xf32>
    %106 = vector.shape_cast %105 : vector<2x1x32xf32> to vector<2x32xf32>
    %107 = vector.shape_cast %104 : vector<2x32xf32> to vector<2x1x32xf32>
    tpu.vector_store %arg4[%c0_30, %c2_31, %c0_32], %107 {strides = array<i32>} : memref<2x8x32xf32, #tpu.memory_space<vmem>>, vector<2x1x32xf32>,
    %c0_33 = arith.constant 0 : index
    %c3 = arith.constant 3 : index
    %c0_34 = arith.constant 0 : index
    %108 = vector.load %arg1[%c0_33, %c3, %c0_34] : memref<2x8x96xf32, #tpu.memory_space<vmem>>, vector<2x1x96xf32>
    %109 = vector.shape_cast %108 : vector<2x1x96xf32> to vector<2x96xf32>
    %cst_35 = arith.constant dense<0.000000e+00> : vector<2x96xf32>
    %110 = tpu.matmul %104, %3, %cst_35 {dimension_numbers = #tpu.dot_dimension_numbers<[1], [0], [0], [1], [0, 0, 1, 1], [], []>} : vector<2x32xf32>, vector<32x96xf32>, vector<2x96xf32> -> vector<2x96xf32>
    %111 = vector.broadcast %4 : vector<1x96xf32> to vector<2x96xf32>
    %112 = arith.addf %110, %111 : vector<2x96xf32>
    %113 = vector.extract_strided_slice %109 {offsets = [0, 0], sizes = [2, 32], strides = [1, 1]} : vector<2x96xf32> to vector<2x32xf32>
    %114 = vector.extract_strided_slice %112 {offsets = [0, 0], sizes = [2, 32], strides = [1, 1]} : vector<2x96xf32> to vector<2x32xf32>
    %115 = arith.addf %113, %114 : vector<2x32xf32>
    %116 = arith.negf %115 : vector<2x32xf32>
    %117 = math.exp %116 : vector<2x32xf32>
    %cst_36 = arith.constant 1.000000e+00 : f32
    %118 = vector.broadcast %cst_36 : f32 to vector<2x32xf32>
    %119 = arith.addf %118, %117 : vector<2x32xf32>
    %120 = arith.divf %118, %119 : vector<2x32xf32>
    %121 = vector.extract_strided_slice %109 {offsets = [0, 32], sizes = [2, 32], strides = [1, 1]} : vector<2x96xf32> to vector<2x32xf32>
    %122 = vector.extract_strided_slice %112 {offsets = [0, 32], sizes = [2, 32], strides = [1, 1]} : vector<2x96xf32> to vector<2x32xf32>
    %123 = arith.addf %121, %122 : vector<2x32xf32>
    %124 = arith.negf %123 : vector<2x32xf32>
    %125 = math.exp %124 : vector<2x32xf32>
    %cst_37 = arith.constant 1.000000e+00 : f32
    %126 = vector.broadcast %cst_37 : f32 to vector<2x32xf32>
    %127 = arith.addf %126, %125 : vector<2x32xf32>
    %128 = arith.divf %126, %127 : vector<2x32xf32>
    %129 = vector.extract_strided_slice %109 {offsets = [0, 64], sizes = [2, 32], strides = [1, 1]} : vector<2x96xf32> to vector<2x32xf32>
    %130 = vector.extract_strided_slice %112 {offsets = [0, 64], sizes = [2, 32], strides = [1, 1]} : vector<2x96xf32> to vector<2x32xf32>
    %131 = arith.mulf %120, %130 : vector<2x32xf32>
    %132 = arith.addf %129, %131 : vector<2x32xf32>
    %133 = math.tanh %132 : vector<2x32xf32>
    %cst_38 = arith.constant 1.000000e+00 : f32
    %134 = vector.broadcast %cst_38 : f32 to vector<2x32xf32>
    %135 = arith.subf %134, %128 : vector<2x32xf32>
    %136 = arith.mulf %135, %133 : vector<2x32xf32>
    %137 = arith.mulf %128, %104 : vector<2x32xf32>
    %138 = arith.addf %136, %137 : vector<2x32xf32>
    %c0_39 = arith.constant 0 : index
    %c3_40 = arith.constant 3 : index
    %c0_41 = arith.constant 0 : index
    %139 = vector.load %arg4[%c0_39, %c3_40, %c0_41] : memref<2x8x32xf32, #tpu.memory_space<vmem>>, vector<2x1x32xf32>
    %140 = vector.shape_cast %139 : vector<2x1x32xf32> to vector<2x32xf32>
    %141 = vector.shape_cast %138 : vector<2x32xf32> to vector<2x1x32xf32>
    tpu.vector_store %arg4[%c0_39, %c3_40, %c0_41], %141 {strides = array<i32>} : memref<2x8x32xf32, #tpu.memory_space<vmem>>, vector<2x1x32xf32>,
    %c0_42 = arith.constant 0 : index
    %c4 = arith.constant 4 : index
    %c0_43 = arith.constant 0 : index
    %142 = vector.load %arg1[%c0_42, %c4, %c0_43] : memref<2x8x96xf32, #tpu.memory_space<vmem>>, vector<2x1x96xf32>
    %143 = vector.shape_cast %142 : vector<2x1x96xf32> to vector<2x96xf32>
    %cst_44 = arith.constant dense<0.000000e+00> : vector<2x96xf32>
    %144 = tpu.matmul %138, %3, %cst_44 {dimension_numbers = #tpu.dot_dimension_numbers<[1], [0], [0], [1], [0, 0, 1, 1], [], []>} : vector<2x32xf32>, vector<32x96xf32>, vector<2x96xf32> -> vector<2x96xf32>
    %145 = vector.broadcast %4 : vector<1x96xf32> to vector<2x96xf32>
    %146 = arith.addf %144, %145 : vector<2x96xf32>
    %147 = vector.extract_strided_slice %143 {offsets = [0, 0], sizes = [2, 32], strides = [1, 1]} : vector<2x96xf32> to vector<2x32xf32>
    %148 = vector.extract_strided_slice %146 {offsets = [0, 0], sizes = [2, 32], strides = [1, 1]} : vector<2x96xf32> to vector<2x32xf32>
    %149 = arith.addf %147, %148 : vector<2x32xf32>
    %150 = arith.negf %149 : vector<2x32xf32>
    %151 = math.exp %150 : vector<2x32xf32>
    %cst_45 = arith.constant 1.000000e+00 : f32
    %152 = vector.broadcast %cst_45 : f32 to vector<2x32xf32>
    %153 = arith.addf %152, %151 : vector<2x32xf32>
    %154 = arith.divf %152, %153 : vector<2x32xf32>
    %155 = vector.extract_strided_slice %143 {offsets = [0, 32], sizes = [2, 32], strides = [1, 1]} : vector<2x96xf32> to vector<2x32xf32>
    %156 = vector.extract_strided_slice %146 {offsets = [0, 32], sizes = [2, 32], strides = [1, 1]} : vector<2x96xf32> to vector<2x32xf32>
    %157 = arith.addf %155, %156 : vector<2x32xf32>
    %158 = arith.negf %157 : vector<2x32xf32>
    %159 = math.exp %158 : vector<2x32xf32>
    %cst_46 = arith.constant 1.000000e+00 : f32
    %160 = vector.broadcast %cst_46 : f32 to vector<2x32xf32>
    %161 = arith.addf %160, %159 : vector<2x32xf32>
    %162 = arith.divf %160, %161 : vector<2x32xf32>
    %163 = vector.extract_strided_slice %143 {offsets = [0, 64], sizes = [2, 32], strides = [1, 1]} : vector<2x96xf32> to vector<2x32xf32>
    %164 = vector.extract_strided_slice %146 {offsets = [0, 64], sizes = [2, 32], strides = [1, 1]} : vector<2x96xf32> to vector<2x32xf32>
    %165 = arith.mulf %154, %164 : vector<2x32xf32>
    %166 = arith.addf %163, %165 : vector<2x32xf32>
    %167 = math.tanh %166 : vector<2x32xf32>
    %cst_47 = arith.constant 1.000000e+00 : f32
    %168 = vector.broadcast %cst_47 : f32 to vector<2x32xf32>
    %169 = arith.subf %168, %162 : vector<2x32xf32>
    %170 = arith.mulf %169, %167 : vector<2x32xf32>
    %171 = arith.mulf %162, %138 : vector<2x32xf32>
    %172 = arith.addf %170, %171 : vector<2x32xf32>
    %c0_48 = arith.constant 0 : index
    %c4_49 = arith.constant 4 : index
    %c0_50 = arith.constant 0 : index
    %173 = vector.load %arg4[%c0_48, %c4_49, %c0_50] : memref<2x8x32xf32, #tpu.memory_space<vmem>>, vector<2x1x32xf32>
    %174 = vector.shape_cast %173 : vector<2x1x32xf32> to vector<2x32xf32>
    %175 = vector.shape_cast %172 : vector<2x32xf32> to vector<2x1x32xf32>
    tpu.vector_store %arg4[%c0_48, %c4_49, %c0_50], %175 {strides = array<i32>} : memref<2x8x32xf32, #tpu.memory_space<vmem>>, vector<2x1x32xf32>,
    %c0_51 = arith.constant 0 : index
    %c5 = arith.constant 5 : index
    %c0_52 = arith.constant 0 : index
    %176 = vector.load %arg1[%c0_51, %c5, %c0_52] : memref<2x8x96xf32, #tpu.memory_space<vmem>>, vector<2x1x96xf32>
    %177 = vector.shape_cast %176 : vector<2x1x96xf32> to vector<2x96xf32>
    %cst_53 = arith.constant dense<0.000000e+00> : vector<2x96xf32>
    %178 = tpu.matmul %172, %3, %cst_53 {dimension_numbers = #tpu.dot_dimension_numbers<[1], [0], [0], [1], [0, 0, 1, 1], [], []>} : vector<2x32xf32>, vector<32x96xf32>, vector<2x96xf32> -> vector<2x96xf32>
    %179 = vector.broadcast %4 : vector<1x96xf32> to vector<2x96xf32>
    %180 = arith.addf %178, %179 : vector<2x96xf32>
    %181 = vector.extract_strided_slice %177 {offsets = [0, 0], sizes = [2, 32], strides = [1, 1]} : vector<2x96xf32> to vector<2x32xf32>
    %182 = vector.extract_strided_slice %180 {offsets = [0, 0], sizes = [2, 32], strides = [1, 1]} : vector<2x96xf32> to vector<2x32xf32>
    %183 = arith.addf %181, %182 : vector<2x32xf32>
    %184 = arith.negf %183 : vector<2x32xf32>
    %185 = math.exp %184 : vector<2x32xf32>
    %cst_54 = arith.constant 1.000000e+00 : f32
    %186 = vector.broadcast %cst_54 : f32 to vector<2x32xf32>
    %187 = arith.addf %186, %185 : vector<2x32xf32>
    %188 = arith.divf %186, %187 : vector<2x32xf32>
    %189 = vector.extract_strided_slice %177 {offsets = [0, 32], sizes = [2, 32], strides = [1, 1]} : vector<2x96xf32> to vector<2x32xf32>
    %190 = vector.extract_strided_slice %180 {offsets = [0, 32], sizes = [2, 32], strides = [1, 1]} : vector<2x96xf32> to vector<2x32xf32>
    %191 = arith.addf %189, %190 : vector<2x32xf32>
    %192 = arith.negf %191 : vector<2x32xf32>
    %193 = math.exp %192 : vector<2x32xf32>
    %cst_55 = arith.constant 1.000000e+00 : f32
    %194 = vector.broadcast %cst_55 : f32 to vector<2x32xf32>
    %195 = arith.addf %194, %193 : vector<2x32xf32>
    %196 = arith.divf %194, %195 : vector<2x32xf32>
    %197 = vector.extract_strided_slice %177 {offsets = [0, 64], sizes = [2, 32], strides = [1, 1]} : vector<2x96xf32> to vector<2x32xf32>
    %198 = vector.extract_strided_slice %180 {offsets = [0, 64], sizes = [2, 32], strides = [1, 1]} : vector<2x96xf32> to vector<2x32xf32>
    %199 = arith.mulf %188, %198 : vector<2x32xf32>
    %200 = arith.addf %197, %199 : vector<2x32xf32>
    %201 = math.tanh %200 : vector<2x32xf32>
    %cst_56 = arith.constant 1.000000e+00 : f32
    %202 = vector.broadcast %cst_56 : f32 to vector<2x32xf32>
    %203 = arith.subf %202, %196 : vector<2x32xf32>
    %204 = arith.mulf %203, %201 : vector<2x32xf32>
    %205 = arith.mulf %196, %172 : vector<2x32xf32>
    %206 = arith.addf %204, %205 : vector<2x32xf32>
    %c0_57 = arith.constant 0 : index
    %c5_58 = arith.constant 5 : index
    %c0_59 = arith.constant 0 : index
    %207 = vector.load %arg4[%c0_57, %c5_58, %c0_59] : memref<2x8x32xf32, #tpu.memory_space<vmem>>, vector<2x1x32xf32>
    %208 = vector.shape_cast %207 : vector<2x1x32xf32> to vector<2x32xf32>
    %209 = vector.shape_cast %206 : vector<2x32xf32> to vector<2x1x32xf32>
    tpu.vector_store %arg4[%c0_57, %c5_58, %c0_59], %209 {strides = array<i32>} : memref<2x8x32xf32, #tpu.memory_space<vmem>>, vector<2x1x32xf32>,
    %c0_60 = arith.constant 0 : index
    %c6 = arith.constant 6 : index
    %c0_61 = arith.constant 0 : index
    %210 = vector.load %arg1[%c0_60, %c6, %c0_61] : memref<2x8x96xf32, #tpu.memory_space<vmem>>, vector<2x1x96xf32>
    %211 = vector.shape_cast %210 : vector<2x1x96xf32> to vector<2x96xf32>
    %cst_62 = arith.constant dense<0.000000e+00> : vector<2x96xf32>
    %212 = tpu.matmul %206, %3, %cst_62 {dimension_numbers = #tpu.dot_dimension_numbers<[1], [0], [0], [1], [0, 0, 1, 1], [], []>} : vector<2x32xf32>, vector<32x96xf32>, vector<2x96xf32> -> vector<2x96xf32>
    %213 = vector.broadcast %4 : vector<1x96xf32> to vector<2x96xf32>
    %214 = arith.addf %212, %213 : vector<2x96xf32>
    %215 = vector.extract_strided_slice %211 {offsets = [0, 0], sizes = [2, 32], strides = [1, 1]} : vector<2x96xf32> to vector<2x32xf32>
    %216 = vector.extract_strided_slice %214 {offsets = [0, 0], sizes = [2, 32], strides = [1, 1]} : vector<2x96xf32> to vector<2x32xf32>
    %217 = arith.addf %215, %216 : vector<2x32xf32>
    %218 = arith.negf %217 : vector<2x32xf32>
    %219 = math.exp %218 : vector<2x32xf32>
    %cst_63 = arith.constant 1.000000e+00 : f32
    %220 = vector.broadcast %cst_63 : f32 to vector<2x32xf32>
    %221 = arith.addf %220, %219 : vector<2x32xf32>
    %222 = arith.divf %220, %221 : vector<2x32xf32>
    %223 = vector.extract_strided_slice %211 {offsets = [0, 32], sizes = [2, 32], strides = [1, 1]} : vector<2x96xf32> to vector<2x32xf32>
    %224 = vector.extract_strided_slice %214 {offsets = [0, 32], sizes = [2, 32], strides = [1, 1]} : vector<2x96xf32> to vector<2x32xf32>
    %225 = arith.addf %223, %224 : vector<2x32xf32>
    %226 = arith.negf %225 : vector<2x32xf32>
    %227 = math.exp %226 : vector<2x32xf32>
    %cst_64 = arith.constant 1.000000e+00 : f32
    %228 = vector.broadcast %cst_64 : f32 to vector<2x32xf32>
    %229 = arith.addf %228, %227 : vector<2x32xf32>
    %230 = arith.divf %228, %229 : vector<2x32xf32>
    %231 = vector.extract_strided_slice %211 {offsets = [0, 64], sizes = [2, 32], strides = [1, 1]} : vector<2x96xf32> to vector<2x32xf32>
    %232 = vector.extract_strided_slice %214 {offsets = [0, 64], sizes = [2, 32], strides = [1, 1]} : vector<2x96xf32> to vector<2x32xf32>
    %233 = arith.mulf %222, %232 : vector<2x32xf32>
    %234 = arith.addf %231, %233 : vector<2x32xf32>
    %235 = math.tanh %234 : vector<2x32xf32>
    %cst_65 = arith.constant 1.000000e+00 : f32
    %236 = vector.broadcast %cst_65 : f32 to vector<2x32xf32>
    %237 = arith.subf %236, %230 : vector<2x32xf32>
    %238 = arith.mulf %237, %235 : vector<2x32xf32>
    %239 = arith.mulf %230, %206 : vector<2x32xf32>
    %240 = arith.addf %238, %239 : vector<2x32xf32>
    %c0_66 = arith.constant 0 : index
    %c6_67 = arith.constant 6 : index
    %c0_68 = arith.constant 0 : index
    %241 = vector.load %arg4[%c0_66, %c6_67, %c0_68] : memref<2x8x32xf32, #tpu.memory_space<vmem>>, vector<2x1x32xf32>
    %242 = vector.shape_cast %241 : vector<2x1x32xf32> to vector<2x32xf32>
    %243 = vector.shape_cast %240 : vector<2x32xf32> to vector<2x1x32xf32>
    tpu.vector_store %arg4[%c0_66, %c6_67, %c0_68], %243 {strides = array<i32>} : memref<2x8x32xf32, #tpu.memory_space<vmem>>, vector<2x1x32xf32>,
    %c0_69 = arith.constant 0 : index
    %c7 = arith.constant 7 : index
    %c0_70 = arith.constant 0 : index
    %244 = vector.load %arg1[%c0_69, %c7, %c0_70] : memref<2x8x96xf32, #tpu.memory_space<vmem>>, vector<2x1x96xf32>
    %245 = vector.shape_cast %244 : vector<2x1x96xf32> to vector<2x96xf32>
    %cst_71 = arith.constant dense<0.000000e+00> : vector<2x96xf32>
    %246 = tpu.matmul %240, %3, %cst_71 {dimension_numbers = #tpu.dot_dimension_numbers<[1], [0], [0], [1], [0, 0, 1, 1], [], []>} : vector<2x32xf32>, vector<32x96xf32>, vector<2x96xf32> -> vector<2x96xf32>
    %247 = vector.broadcast %4 : vector<1x96xf32> to vector<2x96xf32>
    %248 = arith.addf %246, %247 : vector<2x96xf32>
    %249 = vector.extract_strided_slice %245 {offsets = [0, 0], sizes = [2, 32], strides = [1, 1]} : vector<2x96xf32> to vector<2x32xf32>
    %250 = vector.extract_strided_slice %248 {offsets = [0, 0], sizes = [2, 32], strides = [1, 1]} : vector<2x96xf32> to vector<2x32xf32>
    %251 = arith.addf %249, %250 : vector<2x32xf32>
    %252 = arith.negf %251 : vector<2x32xf32>
    %253 = math.exp %252 : vector<2x32xf32>
    %cst_72 = arith.constant 1.000000e+00 : f32
    %254 = vector.broadcast %cst_72 : f32 to vector<2x32xf32>
    %255 = arith.addf %254, %253 : vector<2x32xf32>
    %256 = arith.divf %254, %255 : vector<2x32xf32>
    %257 = vector.extract_strided_slice %245 {offsets = [0, 32], sizes = [2, 32], strides = [1, 1]} : vector<2x96xf32> to vector<2x32xf32>
    %258 = vector.extract_strided_slice %248 {offsets = [0, 32], sizes = [2, 32], strides = [1, 1]} : vector<2x96xf32> to vector<2x32xf32>
    %259 = arith.addf %257, %258 : vector<2x32xf32>
    %260 = arith.negf %259 : vector<2x32xf32>
    %261 = math.exp %260 : vector<2x32xf32>
    %cst_73 = arith.constant 1.000000e+00 : f32
    %262 = vector.broadcast %cst_73 : f32 to vector<2x32xf32>
    %263 = arith.addf %262, %261 : vector<2x32xf32>
    %264 = arith.divf %262, %263 : vector<2x32xf32>
    %265 = vector.extract_strided_slice %245 {offsets = [0, 64], sizes = [2, 32], strides = [1, 1]} : vector<2x96xf32> to vector<2x32xf32>
    %266 = vector.extract_strided_slice %248 {offsets = [0, 64], sizes = [2, 32], strides = [1, 1]} : vector<2x96xf32> to vector<2x32xf32>
    %267 = arith.mulf %256, %266 : vector<2x32xf32>
    %268 = arith.addf %265, %267 : vector<2x32xf32>
    %269 = math.tanh %268 : vector<2x32xf32>
    %cst_74 = arith.constant 1.000000e+00 : f32
    %270 = vector.broadcast %cst_74 : f32 to vector<2x32xf32>
    %271 = arith.subf %270, %264 : vector<2x32xf32>
    %272 = arith.mulf %271, %269 : vector<2x32xf32>
    %273 = arith.mulf %264, %240 : vector<2x32xf32>
    %274 = arith.addf %272, %273 : vector<2x32xf32>
    %c0_75 = arith.constant 0 : index
    %c7_76 = arith.constant 7 : index
    %c0_77 = arith.constant 0 : index
    %275 = vector.load %arg4[%c0_75, %c7_76, %c0_77] : memref<2x8x32xf32, #tpu.memory_space<vmem>>, vector<2x1x32xf32>
    %276 = vector.shape_cast %275 : vector<2x1x32xf32> to vector<2x32xf32>
    %277 = vector.shape_cast %274 : vector<2x32xf32> to vector<2x1x32xf32>
    tpu.vector_store %arg4[%c0_75, %c7_76, %c0_77], %277 {strides = array<i32>} : memref<2x8x32xf32, #tpu.memory_space<vmem>>, vector<2x1x32xf32>,
    %c0_78 = arith.constant 0 : index
    %c0_79 = arith.constant 0 : index
    %278 = vector.load %arg5[%c0_78, %c0_79] : memref<2x32xf32, #tpu.memory_space<vmem>>, vector<2x32xf32>
    tpu.vector_store %arg5[%c0_78, %c0_79], %274 {strides = array<i32>} : memref<2x32xf32, #tpu.memory_space<vmem>>, vector<2x32xf32>,
    return
  }
  func.func @transform_0(%arg0: i32) -> (i32, i32, i32) {
    %c0_i32 = arith.constant 0 : i32
    %c0_i32_0 = arith.constant 0 : i32
    %c0_i32_1 = arith.constant 0 : i32
    return %c0_i32, %arg0, %c0_i32_0 : i32, i32, i32
  }
  func.func @transform_1(%arg0: i32) -> (i32, i32) {
    %c0_i32 = arith.constant 0 : i32
    %c0_i32_0 = arith.constant 0 : i32
    %c0_i32_1 = arith.constant 0 : i32
    return %c0_i32, %c0_i32_0 : i32, i32
  }
  func.func @transform_2(%arg0: i32) -> (i32, i32) {
    %c0_i32 = arith.constant 0 : i32
    %c0_i32_0 = arith.constant 0 : i32
    %c0_i32_1 = arith.constant 0 : i32
    return %c0_i32, %c0_i32_0 : i32, i32
  }
  func.func @transform_3(%arg0: i32) -> (i32, i32, i32) {
    %c0_i32 = arith.constant 0 : i32
    %c0_i32_0 = arith.constant 0 : i32
    %c0_i32_1 = arith.constant 0 : i32
    return %c0_i32, %arg0, %c0_i32_0 : i32, i32, i32
  }
}

</mosaic_0001>

<bundles_post_ra>
// kernel: tpu_custom_call.1
= control target key start
LH: loop header
LB: loop body
LE: loop exit
PB: predicated region body
PF: predicated region fallthrough
CT: control target
= control target key end

     0   :  { %8 = vsyncpa [#allocation4], 0  ;;  %s1875_s0 = inlined_call_operand.hbm [shape: f32[2,8,96], index: 0, kind: input, shape index: {}]   ;;  %s1876_s1 = inlined_call_operand.hbm [shape: f32[32,96], index: 1, kind: input, shape index: {}]   ;;  %s1877_s2 = inlined_call_operand.vmem [shape: f32[1,96], index: 2, kind: input, shape index: {}]   ;;  %s1878_s3 = inlined_call_operand.hbm [shape: f32[2,8,32], index: 3, kind: output, shape index: {}]  }
   0x1   :  { %9 = vsyncpa [#allocation7], 0 }
   0x2   :  { %10 = vsyncpa [#allocation5], 0  ;;  %s1554_s12 = smov [#allocation3]  }
   0x3   :  { %s16_s13 = sshll.u32 %s1554_s12, 4  ;;  %s17_s13 = int_to_ptr.vmem [resolvable:$true] %s16_s13 }
   0x4   :  { %s1496_s14 = scalar_lea.vmem %s17_s13, 256  ;;  %p1501_p1 = scmp.lt.s32.totalorder %s17_s13, %s17_s13 }
   0x5   :  { %p1497_p0 = scmp.ne.s32.totalorder %s17_s13, %s1496_s14  ;;  %p1502_p2 = scmp.lt.s32.totalorder %s1496_s14, %s1496_s14 }
   0x7   :  { %p1503_p3 = por %p1502_p2, %p1501_p1 }
   0x9   :  { %p1504_p4 = pnand %p1503_p3, %p1497_p0 }
   0xb   :  { %1507 = shalt.err (!%p1504_p4)
}
   0xc   :  { %s1555_s15 = smov 128   ;;  %s1556_s16 = smov 8  }
   0xd   :  { %22 = dma.hbm_to_vmem [thread:$0]  %s1875_s0, 256, %s17_s13, [#allocation4], %s1555_s15, %s1555_s15, %s1556_s16  }
   0xe   :  { %s1557_s19 = smov [#allocation6]  }
   0xf   :  { %s28_s20 = sshll.u32 %s1557_s19, 4  ;;  %s29_s20 = int_to_ptr.vmem [resolvable:$true] %s28_s20 }
  0x10   :  { %s1516_s21 = scalar_lea.vmem %s29_s20, 512  ;;  %p1521_p6 = scmp.lt.s32.totalorder %s29_s20, %s29_s20 }
  0x11   :  { %p1517_p5 = scmp.ne.s32.totalorder %s29_s20, %s1516_s21  ;;  %p1522_p7 = scmp.lt.s32.totalorder %s1516_s21, %s1516_s21 }
  0x13   :  { %p1523_p8 = por %p1522_p7, %p1521_p6 }
  0x15   :  { %p1524_p9 = pnand %p1523_p8, %p1517_p5 }
  0x17   :  { %1527 = shalt.err (!%p1524_p9)
}
  0x18   :  { %34 = dma.hbm_to_vmem [thread:$0]  %s1876_s1, 512, %s29_s20, [#allocation7], %s1555_s15, %s1555_s15, %s1556_s16  }
  0x19   :  { %1548 = dma.done.wait [#allocation4], 256  }
  0x1a   :  { %1549 = vsyncadd [#allocation4], 4294967040 }
  0x1b   :  { %1550 = dma.done.wait [#allocation7], 512  }
  0x1c   :  { %1551 = vsyncadd [#allocation7], 4294966784  ;;  %vm47_vm0 = vcmask 254976   ;;  %v1558_v0 = vmov 0.0   ;;  %vm1559_vm1 = vmmov 0   ;;  %v1604_v1 = vld [vmem:[#allocation6 + $0x18] sm:$0xff] }
  0x1d   :  { %1294 = vmatprep.subr.mxu0 %v1558_v0  ;;  %1302 = vmatprep.mubr.msk.f32.mxu0 %vm1559_vm1, %v1558_v0  ;;  %48 = vst.msk [vmem:[#allocation2] sm:$0x3] %vm47_vm0, %v1558_v0  ;;  %v1606_v2 = vld [vmem:[#allocation6 + $0x10] sm:$0xff]  ;;  %v1611_v3 = vld [vmem:[#allocation6 + $0x8] sm:$0xff]  ;;  %v1617_v4 = vld [vmem:[#allocation6] sm:$0xff]  ;;  %vm63_vm2 = vcmask 261120  }
  0x1e   :  { %1305 = vmatprep.subr.mxu1 %v1558_v0  ;;  %1313 = vmatprep.mubr.msk.f32.mxu1 %vm1559_vm1, %v1558_v0  ;;  %v1642_v6 = vld [vmem:[%s1877_s2] ss:$0 sm:$0xff]  ;;  %s1560_s24 = smov 64   ;;  %v56_v11 = vld [vmem:[#allocation3 + $0x8] sm:$0x1]  ;;  %s1561_s2 = smov 32  }
  0x1f   :  { %1295 = vmatpush3.msra.mxu0 %v1604_v1  ;;  %1306 = vmatpush3.msra.mxu1 %v1604_v1  ;;  %v55_v13 = vld [vmem:[#allocation3] sm:$0x1]  ;;  %s1562_s25 = smov 96   ;;  %vm212_vm3 = vcmask 1041409   ;;  %v209_v53 = vld [vmem:[#allocation3 + $0x1] sm:$0x1] }
  0x20   :  { %1296 = vmatprep.subr.mxu0 %v1558_v0  ;;  %1307 = vmatprep.subr.mxu1 %v1558_v0  ;;  %v210_v54 = vld [vmem:[#allocation3 + $0x9] sm:$0x1]  ;;  %vm206_vm4 = vcmask 253952   ;;  %s1563_s26 = smov [#allocation8]  }
  0x21   :  { %1297 = vmatpush3.msra.mxu0 %v1606_v2  ;;  %1308 = vmatpush3.msra.mxu1 %v1606_v2  ;;  %s1216_s27 = sshll.u32 %s1563_s26, 4  ;;  %s1217_s27 = int_to_ptr.vmem [resolvable:$true] %s1216_s27 }
  0x22   :  { %1298 = vmatprep.subr.mxu0 %v1558_v0  ;;  %1309 = vmatprep.subr.mxu1 %v1558_v0  ;;  %s1528_s28 = scalar_lea.vmem %s1217_s27, 256  ;;  %p1533_p11 = scmp.lt.s32.totalorder %s1217_s27, %s1217_s27 }
  0x23   :  { %1299 = vmatpush3.msra.mxu0 %v1611_v3  ;;  %1310 = vmatpush3.msra.mxu1 %v1611_v3  ;;  %p1529_p10 = scmp.ne.s32.totalorder %s1217_s27, %s1528_s28  ;;  %p1534_p12 = scmp.lt.s32.totalorder %s1528_s28, %s1528_s28 }
  0x24   :  { %v54_v5 = vld [vmem:[#allocation2] sm:$0x3]  ;;  %1300 = vmatprep.subr.mxu0 %v1558_v0  ;;  %1311 = vmatprep.subr.mxu1 %v1558_v0 }
  0x25   :  { %1301 = vmatpush3.msra.mxu0 %v1617_v4  ;;  %1312 = vmatpush3.msra.mxu1 %v1617_v4  ;;  %v187_v27 = vrot.slane %v54_v5, 1  ;;  %p1535_p13 = por %p1534_p12, %p1533_p11 }
  0x26   :  { %1303 = vmatmul.mubr.msk.f32.vlgmr.msra.gmra.mxu0 %vm63_vm2, %v54_v5  ;;  %1316 = vmatprep.subr.mxu0 %v1558_v0 }
  0x27   :  { %1317 = vmatpush3.msra.mxu0 %v1604_v1  ;;  %1324 = vmatprep.mubr.msk.f32.mxu0 %vm1559_vm1, %v1558_v0  ;;  %p1536_p0 = pnand %p1535_p13, %p1529_p10 }
  0x28   :  { %1318 = vmatprep.subr.mxu0 %v1558_v0  ;;  %1327 = vmatprep.subr.mxu1 %v1558_v0 }
  0x29   :  { %1319 = vmatpush3.msra.mxu0 %v1606_v2 }
  0x2a   :  { %1320 = vmatprep.subr.mxu0 %v1558_v0 }
  0x2b   :  { %1321 = vmatpush3.msra.mxu0 %v1611_v3 }
  0x2c   :  { %1322 = vmatprep.subr.mxu0 %v1558_v0 }
  0x2d   :  { %1323 = vmatpush3.msra.mxu0 %v1617_v4 }
  0x2e   :  { %1338 = vmatprep.subr.mxu0 %v1558_v0 }
  0xe6   :  { %v133_v7 = vpop.f32.mrf.mxu0 }
  0xe7   :  { %v134_v8 = vadd.f32 %v1642_v6, %v133_v7 }
  0xe8   :  { %v1304_v9 = vpop.f32.mrf.mxu0 }
  0xe9   :  { %v138_v10 = vrot.slane %v134_v8, 1  ;;  %v141_v14 = vadd.f32 %v134_v8, %v55_v13 }
  0xeb   :  { %157 = vrot.lane.b32.xlu0 %v138_v10, %s1560_s24  ;;  %v142_v12 = vadd.f32 %v138_v10, %v56_v11  ;;  %v1231_v16 = vmul.f32 -1.442695, %v141_v14 }
  0xed   :  { %v1232_v15 = vmul.f32 -1.442695, %v142_v12 }
  0xef   :  { %155 = vrot.lane.b32.xlu0 %v134_v8, %s1560_s24  ;;  %1392 = vpow2.f32 %v1232_v15 }
  0xf0   :  { %1394 = vpow2.f32 %v1231_v16 }
  0xfc   :  { %v1393_v17 = vpop.eup %1392 }
  0xfd   :  { %v150_v18 = vadd.f32 1.0, %v1393_v17  ;;  %v1395_v19 = vpop.eup %1394 }
  0xfe   :  { %v149_v20 = vadd.f32 1.0, %v1395_v19 }
  0xff   :  { %1396 = vrcp.f32 %v150_v18 }
 0x100   :  { %1398 = vrcp.f32 %v149_v20 }
 0x10c   :  { %v1397_v21 = vpop.eup %1396 }
 0x10d   :  { %v1399_v24 = vpop.eup %1398  ;;  %v176_v35 = vsub.f32 1.0, %v1397_v21 }
 0x10e   :  { %v175_v41 = vsub.f32 1.0, %v1399_v24 }
 0x15d   :  { %v158_v22 = vpop.permute.xlu0 %157 }
 0x15e   :  { %v162_v23 = vmul.f32 %v1397_v21, %v158_v22 }
 0x160   :  { %167 = vrot.lane.b32.xlu1 %v162_v23, %s1560_s24 }
 0x161   :  { %v156_v25 = vpop.permute.xlu0 %155 }
 0x162   :  { %v161_v26 = vmul.f32 %v1399_v24, %v156_v25 }
 0x164   :  { %165 = vrot.lane.b32.xlu1 %v161_v26, %s1560_s24 }
 0x168   :  { %190 = vrot.lane.b32.xlu1 %v187_v27, %s1561_s2 }
 0x16c   :  { %188 = vrot.lane.b32.xlu1 %v54_v5, %s1561_s2 }
 0x1d2   :  { %v168_v28 = vpop.permute.xlu1 %167 }
 0x1d3   :  { %v172_v29 = vadd.f32 %v168_v28, %v56_v11 }
 0x1d5   :  { %1400 = vtanh.f32 %v172_v29 }
 0x1d6   :  { %v166_v30 = vpop.permute.xlu1 %165 }
 0x1d7   :  { %v171_v31 = vadd.f32 %v166_v30, %v55_v13 }
 0x1d9   :  { %1402 = vtanh.f32 %v171_v31 }
 0x1da   :  { %v191_v34 = vpop.permute.xlu1 %190 }
 0x1db   :  { %v195_v37 = vmul.f32 %v1397_v21, %v191_v34  ;;  %v352_v34 = vld [vmem:[#allocation3 + $0x2] sm:$0x1] }
 0x1de   :  { %v189_v39 = vpop.permute.xlu1 %188 }
 0x1df   :  { %v194_v43 = vmul.f32 %v1399_v24, %v189_v39 }
 0x1e2   :  { %v1401_v32 = vpop.eup %1400 }
 0x1e3   :  { %181 = vrot.lane.b32.xlu0 %v1401_v32, %s1562_s25 }
 0x1e6   :  { %v1403_v33 = vpop.eup %1402 }
 0x1e7   :  { %179 = vrot.lane.b32.xlu0 %v1403_v33, %s1562_s25 }
 0x255   :  { %v182_v36 = vpop.permute.xlu0 %181 }
 0x256   :  { %v186_v38 = vmul.f32 %v182_v36, %v176_v35  ;;  %v353_v35 = vld [vmem:[#allocation3 + $0xa] sm:$0x1] }
 0x258   :  { %v1651_v40 = vadd.f32 %v195_v37, %v186_v38 }
 0x259   :  { %v180_v42 = vpop.permute.xlu0 %179 }
 0x25a   :  { %v185_v44 = vmul.f32 %v180_v42, %v175_v41  ;;  %v211_v46 = vrot.slane %v1651_v40, 7 }
 0x25c   :  { %v1653_v45 = vadd.f32 %v194_v43, %v185_v44 }
 0x25e   :  { %v213_v47 = vsel %vm212_vm3, %v211_v46, %v1653_v45 }
 0x25f   :  { %214 = vrot.lane.b32.xlu0 %v213_v47, %s1562_s25 }
 0x2d1   :  { %v215_v48 = vpop.permute.xlu0 %214 }
 0x2d2   :  { %1314 = vmatmul.mubr.msk.f32.vlgmr.msra.gmra.mxu1 %vm63_vm2, %v215_v48 }
 0x2d3   :  { %1328 = vmatpush3.msra.mxu1 %v1604_v1  ;;  %1335 = vmatprep.mubr.msk.f32.mxu1 %vm1559_vm1, %v1558_v0 }
 0x2d4   :  { %1329 = vmatprep.subr.mxu1 %v1558_v0 }
 0x2d5   :  { %1330 = vmatpush3.msra.mxu1 %v1606_v2 }
 0x2d6   :  { %1331 = vmatprep.subr.mxu1 %v1558_v0 }
 0x2d7   :  { %1332 = vmatpush3.msra.mxu1 %v1611_v3 }
 0x2d8   :  { %1333 = vmatprep.subr.mxu1 %v1558_v0 }
 0x2d9   :  { %1334 = vmatpush3.msra.mxu1 %v1617_v4 }
 0x2da   :  { %1349 = vmatprep.subr.mxu1 %v1558_v0 }
 0x392   :  { %v284_v49 = vpop.f32.mrf.mxu1 }
 0x393   :  { %v285_v50 = vadd.f32 %v1642_v6, %v284_v49 }
 0x394   :  { %v1315_v51 = vpop.f32.mrf.mxu1 }
 0x395   :  { %306 = vrot.lane.b32.xlu0 %v285_v50, %s1560_s24  ;;  %v289_v52 = vrot.slane %v285_v50, 1  ;;  %v292_v55 = vadd.f32 %v285_v50, %v209_v53 }
 0x397   :  { %308 = vrot.lane.b32.xlu1 %v289_v52, %s1560_s24  ;;  %v293_v56 = vadd.f32 %v289_v52, %v210_v54  ;;  %v1234_v57 = vmul.f32 -1.442695, %v292_v55 }
 0x399   :  { %v1235_v58 = vmul.f32 -1.442695, %v293_v56  ;;  %1404 = vpow2.f32 %v1234_v57 }
 0x39b   :  { %1406 = vpow2.f32 %v1235_v58 }
 0x3a6   :  { %v1405_v59 = vpop.eup %1404 }
 0x3a7   :  { %v300_v61 = vadd.f32 1.0, %v1405_v59 }
 0x3a8   :  { %v1407_v60 = vpop.eup %1406 }
 0x3a9   :  { %v301_v62 = vadd.f32 1.0, %v1407_v60  ;;  %1408 = vrcp.f32 %v300_v61 }
 0x3ab   :  { %1410 = vrcp.f32 %v301_v62 }
 0x3b6   :  { %v1409_v63 = vpop.eup %1408 }
 0x3b7   :  { %v326_v18 = vsub.f32 1.0, %v1409_v63  ;;  %v338_v24 = vmul.f32 %v1409_v63, %v1653_v45 }
 0x3b8   :  { %v1411_v8 = vpop.eup %1410 }
 0x3b9   :  { %v327_v19 = vsub.f32 1.0, %v1411_v8  ;;  %v339_v22 = vmul.f32 %v1411_v8, %v1651_v40 }
 0x407   :  { %v307_v5 = vpop.permute.xlu0 %306 }
 0x408   :  { %v312_v7 = vmul.f32 %v1409_v63, %v307_v5 }
 0x409   :  { %v309_v9 = vpop.permute.xlu1 %308 }
 0x40a   :  { %v313_v10 = vmul.f32 %v1411_v8, %v309_v9  ;;  %316 = vrot.lane.b32.xlu0 %v312_v7, %s1560_s24 }
 0x40c   :  { %318 = vrot.lane.b32.xlu1 %v313_v10, %s1560_s24 }
 0x47c   :  { %v317_v11 = vpop.permute.xlu0 %316 }
 0x47d   :  { %v322_v12 = vadd.f32 %v317_v11, %v209_v53 }
 0x47e   :  { %v319_v13 = vpop.permute.xlu1 %318 }
 0x47f   :  { %1412 = vtanh.f32 %v322_v12  ;;  %v323_v14 = vadd.f32 %v319_v13, %v210_v54 }
 0x481   :  { %1414 = vtanh.f32 %v323_v14 }
 0x48c   :  { %v1413_v15 = vpop.eup %1412 }
 0x48d   :  { %330 = vrot.lane.b32.xlu0 %v1413_v15, %s1562_s25 }
 0x48e   :  { %v1415_v16 = vpop.eup %1414 }
 0x48f   :  { %332 = vrot.lane.b32.xlu1 %v1415_v16, %s1562_s25 }
 0x4ff   :  { %v331_v17 = vpop.permute.xlu0 %330 }
 0x500   :  { %v336_v21 = vmul.f32 %v331_v17, %v326_v18  ;;  %v494_v17 = vld [vmem:[#allocation3 + $0x3] sm:$0x1]  ;;  %v495_v18 = vld [vmem:[#allocation3 + $0xb] sm:$0x1] }
 0x501   :  { %v333_v20 = vpop.permute.xlu1 %332 }
 0x502   :  { %v337_v23 = vmul.f32 %v333_v20, %v327_v19  ;;  %v1681_v26 = vadd.f32 %v338_v24, %v336_v21 }
 0x504   :  { %v1679_v25 = vadd.f32 %v339_v22, %v337_v23 }
 0x506   :  { %v354_v27 = vrot.slane %v1679_v25, 7 }
 0x508   :  { %v355_v28 = vsel %vm212_vm3, %v354_v27, %v1681_v26 }
 0x509   :  { %356 = vrot.lane.b32.xlu1 %v355_v28, %s1562_s25 }
 0x57b   :  { %v357_v29 = vpop.permute.xlu1 %356 }
 0x57c   :  { %1325 = vmatmul.mubr.msk.f32.vlgmr.msra.gmra.mxu0 %vm63_vm2, %v357_v29 }
 0x57d   :  { %1339 = vmatpush3.msra.mxu0 %v1604_v1  ;;  %1346 = vmatprep.mubr.msk.f32.mxu0 %vm1559_vm1, %v1558_v0 }
 0x57e   :  { %1340 = vmatprep.subr.mxu0 %v1558_v0 }
 0x57f   :  { %1341 = vmatpush3.msra.mxu0 %v1606_v2 }
 0x580   :  { %1342 = vmatprep.subr.mxu0 %v1558_v0 }
 0x581   :  { %1343 = vmatpush3.msra.mxu0 %v1611_v3 }
 0x582   :  { %1344 = vmatprep.subr.mxu0 %v1558_v0 }
 0x583   :  { %1345 = vmatpush3.msra.mxu0 %v1617_v4 }
 0x584   :  { %1360 = vmatprep.subr.mxu0 %v1558_v0 }
 0x63c   :  { %v426_v30 = vpop.f32.mrf.mxu0 }
 0x63d   :  { %v427_v31 = vadd.f32 %v1642_v6, %v426_v30 }
 0x63e   :  { %v1326_v32 = vpop.f32.mrf.mxu0 }
 0x63f   :  { %448 = vrot.lane.b32.xlu1 %v427_v31, %s1560_s24  ;;  %v431_v33 = vrot.slane %v427_v31, 1  ;;  %v434_v36 = vadd.f32 %v427_v31, %v352_v34 }
 0x641   :  { %450 = vrot.lane.b32.xlu0 %v431_v33, %s1560_s24  ;;  %v435_v37 = vadd.f32 %v431_v33, %v353_v35  ;;  %v1237_v38 = vmul.f32 -1.442695, %v434_v36 }
 0x643   :  { %v1238_v39 = vmul.f32 -1.442695, %v435_v37  ;;  %1416 = vpow2.f32 %v1237_v38 }
 0x645   :  { %1418 = vpow2.f32 %v1238_v39 }
 0x650   :  { %v1417_v41 = vpop.eup %1416 }
 0x651   :  { %v442_v43 = vadd.f32 1.0, %v1417_v41 }
 0x652   :  { %v1419_v42 = vpop.eup %1418 }
 0x653   :  { %v443_v44 = vadd.f32 1.0, %v1419_v42  ;;  %1420 = vrcp.f32 %v442_v43 }
 0x655   :  { %1422 = vrcp.f32 %v443_v44 }
 0x660   :  { %v1421_v46 = vpop.eup %1420 }
 0x661   :  { %v468_v59 = vsub.f32 1.0, %v1421_v46  ;;  %v480_v7 = vmul.f32 %v1421_v46, %v1681_v26 }
 0x662   :  { %v1423_v49 = vpop.eup %1422 }
 0x663   :  { %v469_v60 = vsub.f32 1.0, %v1423_v49  ;;  %v481_v63 = vmul.f32 %v1423_v49, %v1679_v25 }
 0x6b1   :  { %v449_v47 = vpop.permute.xlu1 %448 }
 0x6b2   :  { %v454_v48 = vmul.f32 %v1421_v46, %v449_v47 }
 0x6b3   :  { %v451_v50 = vpop.permute.xlu0 %450 }
 0x6b4   :  { %v455_v51 = vmul.f32 %v1423_v49, %v451_v50  ;;  %458 = vrot.lane.b32.xlu1 %v454_v48, %s1560_s24 }
 0x6b6   :  { %460 = vrot.lane.b32.xlu0 %v455_v51, %s1560_s24 }
 0x726   :  { %v459_v52 = vpop.permute.xlu1 %458 }
 0x727   :  { %v464_v53 = vadd.f32 %v459_v52, %v352_v34 }
 0x728   :  { %v461_v54 = vpop.permute.xlu0 %460 }
 0x729   :  { %1424 = vtanh.f32 %v464_v53  ;;  %v465_v55 = vadd.f32 %v461_v54, %v353_v35 }
 0x72b   :  { %1426 = vtanh.f32 %v465_v55 }
 0x736   :  { %v1425_v56 = vpop.eup %1424 }
 0x737   :  { %472 = vrot.lane.b32.xlu1 %v1425_v56, %s1562_s25 }
 0x738   :  { %v1427_v57 = vpop.eup %1426 }
 0x739   :  { %474 = vrot.lane.b32.xlu0 %v1427_v57, %s1562_s25 }
 0x7a9   :  { %v473_v58 = vpop.permute.xlu1 %472 }
 0x7aa   :  { %v478_v62 = vmul.f32 %v473_v58, %v468_v59 }
 0x7ab   :  { %v475_v61 = vpop.permute.xlu0 %474 }
 0x7ac   :  { %v479_v5 = vmul.f32 %v475_v61, %v469_v60  ;;  %v1709_v9 = vadd.f32 %v480_v7, %v478_v62  ;;  %v636_v60 = vld [vmem:[#allocation3 + $0x4] sm:$0x1]  ;;  %v637_v61 = vld [vmem:[#allocation3 + $0xc] sm:$0x1] }
 0x7ae   :  { %v1707_v8 = vadd.f32 %v481_v63, %v479_v5 }
 0x7b0   :  { %v496_v10 = vrot.slane %v1707_v8, 7 }
 0x7b2   :  { %v497_v11 = vsel %vm212_vm3, %v496_v10, %v1709_v9 }
 0x7b3   :  { %498 = vrot.lane.b32.xlu0 %v497_v11, %s1562_s25 }
 0x825   :  { %v499_v12 = vpop.permute.xlu0 %498 }
 0x826   :  { %1336 = vmatmul.mubr.msk.f32.vlgmr.msra.gmra.mxu1 %vm63_vm2, %v499_v12 }
 0x827   :  { %1350 = vmatpush3.msra.mxu1 %v1604_v1  ;;  %1357 = vmatprep.mubr.msk.f32.mxu1 %vm1559_vm1, %v1558_v0 }
 0x828   :  { %1351 = vmatprep.subr.mxu1 %v1558_v0 }
 0x829   :  { %1352 = vmatpush3.msra.mxu1 %v1606_v2 }
 0x82a   :  { %1353 = vmatprep.subr.mxu1 %v1558_v0 }
 0x82b   :  { %1354 = vmatpush3.msra.mxu1 %v1611_v3 }
 0x82c   :  { %1355 = vmatprep.subr.mxu1 %v1558_v0 }
 0x82d   :  { %1356 = vmatpush3.msra.mxu1 %v1617_v4 }
 0x82e   :  { %1371 = vmatprep.subr.mxu1 %v1558_v0 }
 0x8e6   :  { %v568_v13 = vpop.f32.mrf.mxu1 }
 0x8e7   :  { %v569_v14 = vadd.f32 %v1642_v6, %v568_v13 }
 0x8e8   :  { %v1337_v15 = vpop.f32.mrf.mxu1 }
 0x8e9   :  { %590 = vrot.lane.b32.xlu0 %v569_v14, %s1560_s24  ;;  %v573_v16 = vrot.slane %v569_v14, 1  ;;  %v576_v19 = vadd.f32 %v569_v14, %v494_v17 }
 0x8eb   :  { %592 = vrot.lane.b32.xlu1 %v573_v16, %s1560_s24  ;;  %v577_v20 = vadd.f32 %v573_v16, %v495_v18  ;;  %v1240_v21 = vmul.f32 -1.442695, %v576_v19 }
 0x8ed   :  { %v1241_v22 = vmul.f32 -1.442695, %v577_v20  ;;  %1428 = vpow2.f32 %v1240_v21 }
 0x8ef   :  { %1430 = vpow2.f32 %v1241_v22 }
 0x8fa   :  { %v1429_v23 = vpop.eup %1428 }
 0x8fb   :  { %v584_v27 = vadd.f32 1.0, %v1429_v23 }
 0x8fc   :  { %v1431_v24 = vpop.eup %1430 }
 0x8fd   :  { %v585_v28 = vadd.f32 1.0, %v1431_v24  ;;  %1432 = vrcp.f32 %v584_v27 }
 0x8ff   :  { %1434 = vrcp.f32 %v585_v28 }
 0x90a   :  { %v1433_v29 = vpop.eup %1432 }
 0x90b   :  { %v610_v43 = vsub.f32 1.0, %v1433_v29  ;;  %v622_v50 = vmul.f32 %v1433_v29, %v1709_v9 }
 0x90c   :  { %v1435_v32 = vpop.eup %1434 }
 0x90d   :  { %v611_v44 = vsub.f32 1.0, %v1435_v32  ;;  %v623_v48 = vmul.f32 %v1435_v32, %v1707_v8 }
 0x95b   :  { %v591_v30 = vpop.permute.xlu0 %590 }
 0x95c   :  { %v596_v31 = vmul.f32 %v1433_v29, %v591_v30 }
 0x95d   :  { %v593_v33 = vpop.permute.xlu1 %592 }
 0x95e   :  { %v597_v34 = vmul.f32 %v1435_v32, %v593_v33  ;;  %600 = vrot.lane.b32.xlu0 %v596_v31, %s1560_s24 }
 0x960   :  { %602 = vrot.lane.b32.xlu1 %v597_v34, %s1560_s24 }
 0x9d0   :  { %v601_v35 = vpop.permute.xlu0 %600 }
 0x9d1   :  { %v606_v36 = vadd.f32 %v601_v35, %v494_v17 }
 0x9d2   :  { %v603_v37 = vpop.permute.xlu1 %602 }
 0x9d3   :  { %1436 = vtanh.f32 %v606_v36  ;;  %v607_v38 = vadd.f32 %v603_v37, %v495_v18 }
 0x9d5   :  { %1438 = vtanh.f32 %v607_v38 }
 0x9e0   :  { %v1437_v39 = vpop.eup %1436 }
 0x9e1   :  { %614 = vrot.lane.b32.xlu0 %v1437_v39, %s1562_s25 }
 0x9e2   :  { %v1439_v41 = vpop.eup %1438 }
 0x9e3   :  { %616 = vrot.lane.b32.xlu1 %v1439_v41, %s1562_s25 }
 0xa53   :  { %v615_v42 = vpop.permute.xlu0 %614 }
 0xa54   :  { %v620_v47 = vmul.f32 %v615_v42, %v610_v43 }
 0xa55   :  { %v617_v46 = vpop.permute.xlu1 %616 }
 0xa56   :  { %v621_v49 = vmul.f32 %v617_v46, %v611_v44  ;;  %v1737_v52 = vadd.f32 %v622_v50, %v620_v47  ;;  %v778_v46 = vld [vmem:[#allocation3 + $0x5] sm:$0x1]  ;;  %v779_v47 = vld [vmem:[#allocation3 + $0xd] sm:$0x1] }
 0xa58   :  { %v1735_v51 = vadd.f32 %v623_v48, %v621_v49 }
 0xa5a   :  { %v638_v53 = vrot.slane %v1735_v51, 7 }
 0xa5c   :  { %v639_v54 = vsel %vm212_vm3, %v638_v53, %v1737_v52 }
 0xa5d   :  { %640 = vrot.lane.b32.xlu1 %v639_v54, %s1562_s25 }
 0xacf   :  { %v641_v55 = vpop.permute.xlu1 %640 }
 0xad0   :  { %1347 = vmatmul.mubr.msk.f32.vlgmr.msra.gmra.mxu0 %vm63_vm2, %v641_v55 }
 0xad1   :  { %1361 = vmatpush3.msra.mxu0 %v1604_v1  ;;  %1368 = vmatprep.mubr.msk.f32.mxu0 %vm1559_vm1, %v1558_v0 }
 0xad2   :  { %1362 = vmatprep.subr.mxu0 %v1558_v0 }
 0xad3   :  { %1363 = vmatpush3.msra.mxu0 %v1606_v2 }
 0xad4   :  { %1364 = vmatprep.subr.mxu0 %v1558_v0 }
 0xad5   :  { %1365 = vmatpush3.msra.mxu0 %v1611_v3 }
 0xad6   :  { %1366 = vmatprep.subr.mxu0 %v1558_v0 }
 0xad7   :  { %1367 = vmatpush3.msra.mxu0 %v1617_v4 }
 0xb90   :  { %v710_v56 = vpop.f32.mrf.mxu0 }
 0xb91   :  { %v711_v57 = vadd.f32 %v1642_v6, %v710_v56 }
 0xb92   :  { %v1348_v58 = vpop.f32.mrf.mxu0 }
 0xb93   :  { %732 = vrot.lane.b32.xlu1 %v711_v57, %s1560_s24  ;;  %v715_v59 = vrot.slane %v711_v57, 1  ;;  %v718_v62 = vadd.f32 %v711_v57, %v636_v60 }
 0xb95   :  { %734 = vrot.lane.b32.xlu0 %v715_v59, %s1560_s24  ;;  %v719_v63 = vadd.f32 %v715_v59, %v637_v61  ;;  %v1243_v5 = vmul.f32 -1.442695, %v718_v62 }
 0xb97   :  { %v1244_v7 = vmul.f32 -1.442695, %v719_v63  ;;  %1440 = vpow2.f32 %v1243_v5 }
 0xb99   :  { %1442 = vpow2.f32 %v1244_v7 }
 0xba4   :  { %v1441_v10 = vpop.eup %1440 }
 0xba5   :  { %v726_v12 = vadd.f32 1.0, %v1441_v10 }
 0xba6   :  { %v1443_v11 = vpop.eup %1442 }
 0xba7   :  { %v727_v13 = vadd.f32 1.0, %v1443_v11  ;;  %1444 = vrcp.f32 %v726_v12 }
 0xba9   :  { %1446 = vrcp.f32 %v727_v13 }
 0xbb4   :  { %v1445_v14 = vpop.eup %1444 }
 0xbb5   :  { %v752_v29 = vsub.f32 1.0, %v1445_v14  ;;  %v764_v35 = vmul.f32 %v1445_v14, %v1737_v52 }
 0xbb6   :  { %v1447_v17 = vpop.eup %1446 }
 0xbb7   :  { %v753_v30 = vsub.f32 1.0, %v1447_v17  ;;  %v765_v33 = vmul.f32 %v1447_v17, %v1735_v51 }
 0xc05   :  { %v733_v15 = vpop.permute.xlu1 %732 }
 0xc06   :  { %v738_v16 = vmul.f32 %v1445_v14, %v733_v15 }
 0xc07   :  { %v735_v18 = vpop.permute.xlu0 %734 }
 0xc08   :  { %v739_v19 = vmul.f32 %v1447_v17, %v735_v18  ;;  %742 = vrot.lane.b32.xlu1 %v738_v16, %s1560_s24 }
 0xc0a   :  { %744 = vrot.lane.b32.xlu0 %v739_v19, %s1560_s24 }
 0xc7a   :  { %v743_v20 = vpop.permute.xlu1 %742 }
 0xc7b   :  { %v748_v21 = vadd.f32 %v743_v20, %v636_v60 }
 0xc7c   :  { %v745_v22 = vpop.permute.xlu0 %744 }
 0xc7d   :  { %1448 = vtanh.f32 %v748_v21  ;;  %v749_v23 = vadd.f32 %v745_v22, %v637_v61 }
 0xc7f   :  { %1450 = vtanh.f32 %v749_v23 }
 0xc8a   :  { %v1449_v24 = vpop.eup %1448 }
 0xc8b   :  { %756 = vrot.lane.b32.xlu1 %v1449_v24, %s1562_s25 }
 0xc8c   :  { %v1451_v27 = vpop.eup %1450 }
 0xc8d   :  { %758 = vrot.lane.b32.xlu0 %v1451_v27, %s1562_s25 }
 0xcfd   :  { %v757_v28 = vpop.permute.xlu1 %756 }
 0xcfe   :  { %v762_v32 = vmul.f32 %v757_v28, %v752_v29  ;;  %v920_v29 = vld [vmem:[#allocation3 + $0x6] sm:$0x1] }
 0xcff   :  { %v759_v31 = vpop.permute.xlu0 %758 }
 0xd00   :  { %v763_v34 = vmul.f32 %v759_v31, %v753_v30  ;;  %v1764_v37 = vadd.f32 %v764_v35, %v762_v32  ;;  %v921_v30 = vld [vmem:[#allocation3 + $0xe] sm:$0x1] }
 0xd02   :  { %v1762_v36 = vadd.f32 %v765_v33, %v763_v34 }
 0xd04   :  { %v780_v38 = vrot.slane %v1762_v36, 7 }
 0xd06   :  { %v781_v39 = vsel %vm212_vm3, %v780_v38, %v1764_v37 }
 0xd07   :  { %782 = vrot.lane.b32.xlu0 %v781_v39, %s1562_s25 }
 0xd79   :  { %v783_v41 = vpop.permute.xlu0 %782 }
 0xd7a   :  { %1358 = vmatmul.mubr.msk.f32.vlgmr.msra.gmra.mxu1 %vm63_vm2, %v783_v41 }
 0xd7b   :  { %1372 = vmatpush3.msra.mxu1 %v1604_v1  ;;  %1379 = vmatprep.mubr.msk.f32.mxu1 %vm1559_vm1, %v1558_v0 }
 0xd7c   :  { %1373 = vmatprep.subr.mxu1 %v1558_v0 }
 0xd7d   :  { %1374 = vmatpush3.msra.mxu1 %v1606_v2 }
 0xd7e   :  { %1375 = vmatprep.subr.mxu1 %v1558_v0 }
 0xd7f   :  { %1376 = vmatpush3.msra.mxu1 %v1611_v3 }
 0xd80   :  { %1377 = vmatprep.subr.mxu1 %v1558_v0 }
 0xd81   :  { %1378 = vmatpush3.msra.mxu1 %v1617_v4 }
 0xe3a   :  { %v852_v42 = vpop.f32.mrf.mxu1 }
 0xe3b   :  { %v853_v43 = vadd.f32 %v1642_v6, %v852_v42 }
 0xe3c   :  { %v1359_v44 = vpop.f32.mrf.mxu1 }
 0xe3d   :  { %874 = vrot.lane.b32.xlu0 %v853_v43, %s1560_s24  ;;  %v857_v1 = vrot.slane %v853_v43, 1  ;;  %v860_v2 = vadd.f32 %v853_v43, %v778_v46 }
 0xe3f   :  { %876 = vrot.lane.b32.xlu1 %v857_v1, %s1560_s24  ;;  %v861_v48 = vadd.f32 %v857_v1, %v779_v47  ;;  %v1246_v49 = vmul.f32 -1.442695, %v860_v2 }
 0xe41   :  { %v1247_v50 = vmul.f32 -1.442695, %v861_v48  ;;  %1452 = vpow2.f32 %v1246_v49 }
 0xe43   :  { %1454 = vpow2.f32 %v1247_v50 }
 0xe4e   :  { %v1453_v0 = vpop.eup %1452 }
 0xe4f   :  { %v868_v4 = vadd.f32 1.0, %v1453_v0 }
 0xe50   :  { %v1455_v3 = vpop.eup %1454 }
 0xe51   :  { %v869_v53 = vadd.f32 1.0, %v1455_v3  ;;  %1456 = vrcp.f32 %v868_v4 }
 0xe53   :  { %1458 = vrcp.f32 %v869_v53 }
 0xe5e   :  { %v1457_v54 = vpop.eup %1456 }
 0xe5f   :  { %v894_v11 = vsub.f32 1.0, %v1457_v54  ;;  %v906_v17 = vmul.f32 %v1457_v54, %v1764_v37 }
 0xe60   :  { %v1459_v57 = vpop.eup %1458 }
 0xe61   :  { %v895_v12 = vsub.f32 1.0, %v1459_v57  ;;  %v907_v15 = vmul.f32 %v1459_v57, %v1762_v36 }
 0xeaf   :  { %v875_v55 = vpop.permute.xlu0 %874 }
 0xeb0   :  { %v880_v56 = vmul.f32 %v1457_v54, %v875_v55 }
 0xeb1   :  { %v877_v58 = vpop.permute.xlu1 %876 }
 0xeb2   :  { %v881_v59 = vmul.f32 %v1459_v57, %v877_v58  ;;  %884 = vrot.lane.b32.xlu0 %v880_v56, %s1560_s24 }
 0xeb4   :  { %886 = vrot.lane.b32.xlu1 %v881_v59, %s1560_s24 }
 0xf24   :  { %v885_v60 = vpop.permute.xlu0 %884 }
 0xf25   :  { %v890_v61 = vadd.f32 %v885_v60, %v778_v46 }
 0xf26   :  { %v887_v62 = vpop.permute.xlu1 %886 }
 0xf27   :  { %1460 = vtanh.f32 %v890_v61  ;;  %v891_v63 = vadd.f32 %v887_v62, %v779_v47 }
 0xf29   :  { %1462 = vtanh.f32 %v891_v63 }
 0xf34   :  { %v1461_v5 = vpop.eup %1460 }
 0xf35   :  { %898 = vrot.lane.b32.xlu0 %v1461_v5, %s1562_s25 }
 0xf36   :  { %v1463_v7 = vpop.eup %1462 }
 0xf37   :  { %900 = vrot.lane.b32.xlu1 %v1463_v7, %s1562_s25 }
 0xfa7   :  { %v899_v10 = vpop.permute.xlu0 %898 }
 0xfa8   :  { %v904_v14 = vmul.f32 %v899_v10, %v894_v11 }
 0xfa9   :  { %v901_v13 = vpop.permute.xlu1 %900 }
 0xfaa   :  { %v905_v16 = vmul.f32 %v901_v13, %v895_v12  ;;  %v1791_v19 = vadd.f32 %v906_v17, %v904_v14  ;;  %v1062_v13 = vld [vmem:[#allocation3 + $0x7] sm:$0x1]  ;;  %v1063_v14 = vld [vmem:[#allocation3 + $0xf] sm:$0x1] }
 0xfac   :  { %v1789_v18 = vadd.f32 %v907_v15, %v905_v16 }
 0xfae   :  { %v922_v20 = vrot.slane %v1789_v18, 7 }
 0xfb0   :  { %v923_v21 = vsel %vm212_vm3, %v922_v20, %v1791_v19 }
 0xfb1   :  { %924 = vrot.lane.b32.xlu1 %v923_v21, %s1562_s25 }
0x1023   :  { %v925_v22 = vpop.permute.xlu1 %924 }
0x1024   :  { %1369 = vmatmul.mubr.msk.f32.vlgmr.msra.gmra.mxu0 %vm63_vm2, %v925_v22 }
0x10e4   :  { %v994_v23 = vpop.f32.mrf.mxu0 }
0x10e5   :  { %v995_v24 = vadd.f32 %v1642_v6, %v994_v23 }
0x10e6   :  { %v1370_v27 = vpop.f32.mrf.mxu0 }
0x10e7   :  { %1016 = vrot.lane.b32.xlu1 %v995_v24, %s1560_s24  ;;  %v999_v28 = vrot.slane %v995_v24, 1  ;;  %v1002_v31 = vadd.f32 %v995_v24, %v920_v29 }
0x10e9   :  { %1018 = vrot.lane.b32.xlu0 %v999_v28, %s1560_s24  ;;  %v1003_v32 = vadd.f32 %v999_v28, %v921_v30  ;;  %v1249_v33 = vmul.f32 -1.442695, %v1002_v31 }
0x10eb   :  { %v1250_v34 = vmul.f32 -1.442695, %v1003_v32  ;;  %1464 = vpow2.f32 %v1249_v33 }
0x10ed   :  { %1466 = vpow2.f32 %v1250_v34 }
0x10f8   :  { %v1465_v35 = vpop.eup %1464 }
0x10f9   :  { %v1010_v39 = vadd.f32 1.0, %v1465_v35 }
0x10fa   :  { %v1467_v38 = vpop.eup %1466 }
0x10fb   :  { %v1011_v41 = vadd.f32 1.0, %v1467_v38  ;;  %1468 = vrcp.f32 %v1010_v39 }
0x10fd   :  { %1470 = vrcp.f32 %v1011_v41 }
0x1108   :  { %v1469_v42 = vpop.eup %1468 }
0x1109   :  { %v1036_v53 = vsub.f32 1.0, %v1469_v42  ;;  %v1048_v59 = vmul.f32 %v1469_v42, %v1791_v19 }
0x110a   :  { %v1471_v1 = vpop.eup %1470 }
0x110b   :  { %v1037_v54 = vsub.f32 1.0, %v1471_v1  ;;  %v1049_v57 = vmul.f32 %v1471_v1, %v1789_v18 }
0x1159   :  { %v1017_v43 = vpop.permute.xlu1 %1016 }
0x115a   :  { %v1022_v44 = vmul.f32 %v1469_v42, %v1017_v43 }
0x115b   :  { %v1019_v46 = vpop.permute.xlu0 %1018 }
0x115c   :  { %v1023_v47 = vmul.f32 %v1471_v1, %v1019_v46  ;;  %1026 = vrot.lane.b32.xlu1 %v1022_v44, %s1560_s24 }
0x115e   :  { %1028 = vrot.lane.b32.xlu0 %v1023_v47, %s1560_s24 }
0x11ce   :  { %v1027_v2 = vpop.permute.xlu1 %1026 }
0x11cf   :  { %v1032_v48 = vadd.f32 %v1027_v2, %v920_v29 }
0x11d0   :  { %v1029_v49 = vpop.permute.xlu0 %1028 }
0x11d1   :  { %1472 = vtanh.f32 %v1032_v48  ;;  %v1033_v50 = vadd.f32 %v1029_v49, %v921_v30 }
0x11d3   :  { %1474 = vtanh.f32 %v1033_v50 }
0x11de   :  { %v1473_v0 = vpop.eup %1472 }
0x11df   :  { %1040 = vrot.lane.b32.xlu1 %v1473_v0, %s1562_s25 }
0x11e0   :  { %v1475_v3 = vpop.eup %1474 }
0x11e1   :  { %1042 = vrot.lane.b32.xlu0 %v1475_v3, %s1562_s25 }
0x1251   :  { %v1041_v4 = vpop.permute.xlu1 %1040 }
0x1252   :  { %v1046_v56 = vmul.f32 %v1041_v4, %v1036_v53 }
0x1253   :  { %v1043_v55 = vpop.permute.xlu0 %1042 }
0x1254   :  { %v1047_v58 = vmul.f32 %v1043_v55, %v1037_v54  ;;  %v1050_v61 = vadd.f32 %v1048_v59, %v1046_v56 }
0x1256   :  { %v1807_v60 = vadd.f32 %v1049_v57, %v1047_v58 }
0x1258   :  { %v1064_v62 = vrot.slane %v1807_v60, 7 }
0x125a   :  { %v1065_v63 = vsel %vm212_vm3, %v1064_v62, %v1050_v61 }
0x125b   :  { %1066 = vrot.lane.b32.xlu0 %v1065_v63, %s1562_s25 }
0x12cd   :  { %v1067_v5 = vpop.permute.xlu0 %1066 }
0x12ce   :  { %1380 = vmatmul.mubr.msk.f32.vlgmr.msra.gmra.mxu1 %vm63_vm2, %v1067_v5 }
0x138e   :  { %v1136_v7 = vpop.f32.mrf.mxu1 }
0x138f   :  { %v1137_v10 = vadd.f32 %v1642_v6, %v1136_v7 }
0x1390   :  { %v1381_v11 = vpop.f32.mrf.mxu1 }
0x1391   :  { %1158 = vrot.lane.b32.xlu0 %v1137_v10, %s1560_s24  ;;  %v1141_v12 = vrot.slane %v1137_v10, 1  ;;  %v1144_v15 = vadd.f32 %v1137_v10, %v1062_v13 }
0x1393   :  { %1160 = vrot.lane.b32.xlu1 %v1141_v12, %s1560_s24  ;;  %v1145_v16 = vadd.f32 %v1141_v12, %v1063_v14  ;;  %v1252_v17 = vmul.f32 -1.442695, %v1144_v15 }
0x1395   :  { %v1253_v20 = vmul.f32 -1.442695, %v1145_v16  ;;  %1476 = vpow2.f32 %v1252_v17 }
0x1397   :  { %1478 = vpow2.f32 %v1253_v20 }
0x13a2   :  { %v1477_v21 = vpop.eup %1476 }
0x13a3   :  { %v1152_v23 = vadd.f32 1.0, %v1477_v21 }
0x13a4   :  { %v1479_v22 = vpop.eup %1478 }
0x13a5   :  { %v1153_v24 = vadd.f32 1.0, %v1479_v22  ;;  %1480 = vrcp.f32 %v1152_v23 }
0x13a7   :  { %1482 = vrcp.f32 %v1153_v24 }
0x13b2   :  { %v1481_v6 = vpop.eup %1480 }
0x13b4   :  { %v1483_v29 = vpop.eup %1482 }
0x1403   :  { %v1159_v27 = vpop.permute.xlu0 %1158 }
0x1404   :  { %v1164_v28 = vmul.f32 %v1481_v6, %v1159_v27 }
0x1405   :  { %v1161_v30 = vpop.permute.xlu1 %1160 }
0x1406   :  { %v1165_v31 = vmul.f32 %v1483_v29, %v1161_v30  ;;  %1168 = vrot.lane.b32.xlu0 %v1164_v28, %s1560_s24 }
0x1408   :  { %1170 = vrot.lane.b32.xlu1 %v1165_v31, %s1560_s24 }
0x1478   :  { %v1169_v32 = vpop.permute.xlu0 %1168 }
0x1479   :  { %v1174_v33 = vadd.f32 %v1169_v32, %v1062_v13 }
0x147a   :  { %v1171_v34 = vpop.permute.xlu1 %1170 }
0x147b   :  { %1484 = vtanh.f32 %v1174_v33  ;;  %v1175_v35 = vadd.f32 %v1171_v34, %v1063_v14 }
0x147d   :  { %1486 = vtanh.f32 %v1175_v35 }
0x1488   :  { %v1485_v38 = vpop.eup %1484 }
0x1489   :  { %1182 = vrot.lane.b32.xlu0 %v1485_v38, %s1562_s25 }
0x148a   :  { %v1487_v39 = vpop.eup %1486 }
0x148b   :  { %1184 = vrot.lane.b32.xlu1 %v1487_v39, %s1562_s25 }
0x148d   :  { %202 = vrot.lane.b32.xlu0 %v1651_v40, %s1562_s25  ;;  %v1178_v40 = vsub.f32 1.0, %v1481_v6 }
0x148f   :  { %200 = vrot.lane.b32.xlu1 %v1653_v45, %s1562_s25 }
0x1491   :  { %346 = vrot.lane.b32.xlu0 %v1679_v25, %s1562_s25  ;;  %v1190_v25 = vmul.f32 %v1481_v6, %v1050_v61 }
0x1493   :  { %344 = vrot.lane.b32.xlu1 %v1681_v26, %s1562_s25 }
0x1495   :  { %488 = vrot.lane.b32.xlu0 %v1707_v8, %s1562_s25  ;;  %v1179_v8 = vsub.f32 1.0, %v1483_v29 }
0x1497   :  { %486 = vrot.lane.b32.xlu1 %v1709_v9, %s1562_s25 }
0x1499   :  { %630 = vrot.lane.b32.xlu0 %v1735_v51, %s1562_s25 }
0x149b   :  { %628 = vrot.lane.b32.xlu1 %v1737_v52, %s1562_s25  ;;  %v1191_v52 = vmul.f32 %v1483_v29, %v1807_v60 }
0x149d   :  { %772 = vrot.lane.b32.xlu0 %v1762_v36, %s1562_s25 }
0x149f   :  { %770 = vrot.lane.b32.xlu1 %v1764_v37, %s1562_s25 }
0x14a1   :  { %914 = vrot.lane.b32.xlu0 %v1789_v18, %s1562_s25 }
0x14a3   :  { %912 = vrot.lane.b32.xlu1 %v1791_v19, %s1562_s25 }
0x14a5   :  { %1056 = vrot.lane.b32.xlu0 %v1807_v60, %s1562_s25 }
0x14a7   :  { %1054 = vrot.lane.b32.xlu1 %v1050_v61, %s1562_s25 }
0x14fb   :  { %v1183_v45 = vpop.permute.xlu0 %1182 }
0x14fc   :  { %v1188_v26 = vmul.f32 %v1183_v45, %v1178_v40 }
0x14fd   :  { %v1185_v9 = vpop.permute.xlu1 %1184 }
0x14fe   :  { %v1192_v51 = vadd.f32 %v1190_v25, %v1188_v26  ;;  %v1189_v36 = vmul.f32 %v1185_v9, %v1179_v8 }
0x14ff   :  { %v203_v37 = vpop.permute.xlu0 %202 }
0x1500   :  { %v1193_v18 = vadd.f32 %v1191_v52, %v1189_v36  ;;  %208 = vst.msk [vmem:[#allocation8 + $0x8] sm:$0x1] %vm206_vm4, %v203_v37  ;;  %1196 = vrot.lane.b32.xlu1 %v1192_v51, %s1562_s25 }
0x1501   :  { %v201_v19 = vpop.permute.xlu1 %200 }
0x1502   :  { %v1204_v41 = vrot.slane %v1193_v18, 7  ;;  %207 = vst.msk [vmem:[#allocation8] sm:$0x1] %vm206_vm4, %v201_v19  ;;  %1198 = vrot.lane.b32.xlu0 %v1193_v18, %s1562_s25 }
0x1503   :  { %v347_v42 = vpop.permute.xlu0 %346 }
0x1504   :  { %351 = vst.msk [vmem:[#allocation8 + $0x9] sm:$0x1] %vm206_vm4, %v347_v42  ;;  %v1205_v43 = vsel %vm212_vm3, %v1204_v41, %v1192_v51 }
0x1505   :  { %1206 = vrot.lane.b32.xlu1 %v1205_v43, %s1562_s25  ;;  %v345_v44 = vpop.permute.xlu1 %344 }
0x1506   :  { %350 = vst.msk [vmem:[#allocation8 + $0x1] sm:$0x1] %vm206_vm4, %v345_v44 }
0x1507   :  { %v489_v1 = vpop.permute.xlu0 %488 }
0x1508   :  { %493 = vst.msk [vmem:[#allocation8 + $0xa] sm:$0x1] %vm206_vm4, %v489_v1 }
0x1509   :  { %v487_v46 = vpop.permute.xlu1 %486 }
0x150a   :  { %492 = vst.msk [vmem:[#allocation8 + $0x2] sm:$0x1] %vm206_vm4, %v487_v46 }
0x150b   :  { %v631_v47 = vpop.permute.xlu0 %630 }
0x150c   :  { %635 = vst.msk [vmem:[#allocation8 + $0xb] sm:$0x1] %vm206_vm4, %v631_v47 }
0x150d   :  { %v629_v2 = vpop.permute.xlu1 %628 }
0x150e   :  { %634 = vst.msk [vmem:[#allocation8 + $0x3] sm:$0x1] %vm206_vm4, %v629_v2 }
0x150f   :  { %v773_v48 = vpop.permute.xlu0 %772 }
0x1510   :  { %777 = vst.msk [vmem:[#allocation8 + $0xc] sm:$0x1] %vm206_vm4, %v773_v48 }
0x1511   :  { %v771_v49 = vpop.permute.xlu1 %770 }
0x1512   :  { %776 = vst.msk [vmem:[#allocation8 + $0x4] sm:$0x1] %vm206_vm4, %v771_v49 }
0x1513   :  { %v915_v50 = vpop.permute.xlu0 %914 }
0x1514   :  { %919 = vst.msk [vmem:[#allocation8 + $0xd] sm:$0x1] %vm206_vm4, %v915_v50 }
0x1515   :  { %v913_v0 = vpop.permute.xlu1 %912 }
0x1516   :  { %918 = vst.msk [vmem:[#allocation8 + $0x5] sm:$0x1] %vm206_vm4, %v913_v0 }
0x1517   :  { %v1057_v3 = vpop.permute.xlu0 %1056 }
0x1518   :  { %1061 = vst.msk [vmem:[#allocation8 + $0xe] sm:$0x1] %vm206_vm4, %v1057_v3 }
0x1519   :  { %v1055_v4 = vpop.permute.xlu1 %1054 }
0x151a   :  { %1060 = vst.msk [vmem:[#allocation8 + $0x6] sm:$0x1] %vm206_vm4, %v1055_v4 }
0x1572   :  { %v1197_v53 = vpop.permute.xlu1 %1196 }
0x1573   :  { %1202 = vst.msk [vmem:[#allocation8 + $0x7] sm:$0x1] %vm206_vm4, %v1197_v53 }
0x1574   :  { %v1199_v54 = vpop.permute.xlu0 %1198 }
0x1575   :  { %1203 = vst.msk [vmem:[#allocation8 + $0xf] sm:$0x1] %vm206_vm4, %v1199_v54 }
0x1576   :  { %1539 = shalt.err (!%p1536_p0)
}
0x1577   :  { %1222 = dma.vmem_to_hbm [thread:$0]  %s1217_s27, 256, %s1878_s3, [#allocation5], %s1555_s15, %s1555_s15, %s1556_s16   ;;  %v1207_v55 = vpop.permute.xlu1 %1206 }
0x1578   :  { %1210 = vst.msk [vmem:[#allocation2] sm:$0x3] %vm47_vm0, %v1207_v55 }
0x1579   :  { %1552 = dma.done.wait [#allocation5], 256  }
0x157a   :  { %1553 = vsyncadd [#allocation5], 4294967040 }
0x157b   :  { %1226 = vsyncpa [#allocation4], 1 }
0x157c   :  { %1227 = vsyncpa [#allocation7], 1 }
0x157d   :  { %1228 = vsyncpa [#allocation5], 1 }

</bundles_post_ra>
